<compile_context>
chip_gen: v7x
topology: tpu7x:2x2x1
jax: 0.10.0
libtpu: 0.0.40
codegen_flags: <defaults>
</compile_context>

<pallas_src>
import jax
import jax.numpy as jnp
from jax.experimental import pallas as pl
from jax.experimental.pallas import tpu as pltpu

BN_EPS = 1e-5
CHANNELS = [3, 32, 64, 128, 256, 128, 64, 32]


# --------------------------------------------------------------------------
# In-kernel helpers
# --------------------------------------------------------------------------
def _bias_relu_bn(acc, b, gamma, beta):
    """acc: (M, C) f32 conv pre-activation.  Conv bias -> ReLU -> BatchNorm.

    BatchNorm2d training-mode forward: per-channel batch mean and *biased*
    variance over the M = N*H*W rows, computed in a single pass.
    """
    y = jnp.maximum(acc + b, 0.0)                       # conv bias + ReLU
    m = y.shape[0]
    mean = jnp.sum(y, axis=0, keepdims=True) / m
    var = jnp.sum(y * y, axis=0, keepdims=True) / m - mean * mean
    var = jnp.maximum(var, 0.0)                         # guard one-pass cancellation
    inv = jax.lax.rsqrt(var + BN_EPS)
    return (y - mean) * inv * gamma + beta


# --------------------------------------------------------------------------
# Pallas kernels
# --------------------------------------------------------------------------
def conv_block_kernel(x_ref, w_ref, b_ref, g_ref, be_ref, o_ref):
    """Fused conv (single im2col matmul) + bias + ReLU + BatchNorm.

    x_ref : (M, 9*Cin)   bf16  im2col activation
    w_ref : (9*Cin, Cout) bf16
    b_ref, g_ref, be_ref : (1, Cout) f32
    o_ref : (M, Cout) f32
    """
    acc = jnp.dot(x_ref[...], w_ref[...], preferred_element_type=jnp.float32)
    o_ref[...] = _bias_relu_bn(
        acc, b_ref[...], g_ref[...], be_ref[...]).astype(o_ref.dtype)


def make_tail_kernel(n_blocks):
    """Fused kernel: n_blocks (conv + bias + ReLU + BN) layers -> Linear.

    Every conv here produces a 1x1 spatial output, so each layer is one
    matmul.  All intermediate activations stay in VMEM/vregs; matmul
    operands are bf16, accumulation f32.
    Ref layout (inputs, then output):
      x (N, K0) bf16,
      per block: w (Ki, Ci) bf16, b/g/be (1, Ci) f32,
      dense w (Clast, classes) bf16, dense b (1, classes) f32,
      out (N, classes) f32.
    """
    def kernel(*refs):
        x_ref = refs[0]
        blocks = refs[1:1 + 4 * n_blocks]
        wd_ref = refs[1 + 4 * n_blocks]
        bd_ref = refs[2 + 4 * n_blocks]
        o_ref = refs[-1]

        y = x_ref[...]                                   # bf16
        for k in range(n_blocks):                        # static unroll
            w_k, b_k, g_k, be_k = blocks[4 * k:4 * k + 4]
            acc = jnp.dot(y, w_k[...], preferred_element_type=jnp.float32)
            y = _bias_relu_bn(
                acc, b_k[...], g_k[...], be_k[...]).astype(jnp.bfloat16)

        o_ref[...] = (
            jnp.dot(y, wd_ref[...], preferred_element_type=jnp.float32)
            + bd_ref[...]
        ).astype(o_ref.dtype)

    return kernel


def linear_kernel(x_ref, w_ref, b_ref, o_ref):
    """Standalone dense layer (generic fallback path only)."""
    o_ref[...] = (
        jnp.dot(x_ref[...], w_ref[...], preferred_element_type=jnp.float32)
        + b_ref[...]
    ).astype(o_ref.dtype)


# --------------------------------------------------------------------------
# Glue (plain JAX): im2col extraction + pallas_call wrappers
# --------------------------------------------------------------------------
def _full_spec(shape):
    # full-array block, single grid step
    return pl.BlockSpec(shape, lambda i: (0,) * len(shape))


def _bytes(*arrays):
    return sum(int(a.size) * a.dtype.itemsize for a in arrays)


def conv_block_spatial(x_nhwc, p):
    """One Conv(3x3, stride 2, pad 1) + ReLU + BatchNorm block, any spatial size."""
    n, h, w, cin = x_nhwc.shape
    cout = p["w"].shape[-1]
    ho = (h + 2 - 3) // 2 + 1
    wo = (w + 2 - 3) // 2 + 1
    m = n * ho * wo

    # im2col (strided slices + concat) stays in XLA glue; the conv itself is a
    # single (M, 9*Cin) x (9*Cin, Cout) MXU matmul inside the fused kernel.
    xp = jnp.pad(x_nhwc, ((0, 0), (1, 1), (1, 1), (0, 0)))
    patches = []
    for di in range(3):
        for dj in range(3):
            patches.append(xp[:, di:di + 2 * (ho - 1) + 1:2,
                               dj:dj + 2 * (wo - 1) + 1:2, :])
    col = jnp.concatenate(patches, axis=-1).reshape(m, 9 * cin)
    col = col.astype(jnp.bfloat16)                             # (M, 9*Cin)
    wmat = p["w"].reshape(9 * cin, cout).astype(jnp.bfloat16)  # (9*Cin, Cout)
    b2 = p["b"].reshape(1, cout)
    g2 = p["gamma"].reshape(1, cout)
    be2 = p["beta"].reshape(1, cout)

    args = (col, wmat, b2, g2, be2)
    out = pl.pallas_call(
        conv_block_kernel,
        grid=(1,),
        in_specs=[_full_spec(a.shape) for a in args],
        out_specs=_full_spec((m, cout)),
        out_shape=jax.ShapeDtypeStruct((m, cout), jnp.float32),
        compiler_params=pltpu.CompilerParams(
            dimension_semantics=("arbitrary",)),
        cost_estimate=pl.CostEstimate(
            flops=2 * m * 9 * cin * cout,
            transcendentals=cout,
            bytes_accessed=_bytes(*args) + m * cout * 4),
    )(*args)
    return out.reshape(n, ho, wo, cout)


def fused_tail(x_nhwc, conv_params, dense_w, dense_b):
    """Fuse the remaining conv blocks (input spatial <= 2 => 1x1 outputs,
    non-center taps see only zero padding) plus the Linear into ONE kernel."""
    n, h, w, cin = x_nhwc.shape
    assert h <= 2 and w <= 2
    nb_classes = dense_w.shape[-1]
    p0 = conv_params[0]
    cout0 = p0["w"].shape[-1]

    # First tail conv: only the kernel taps overlapping real pixels matter;
    # stack them along K so the layer is one matmul.
    cols, wrows = [], []
    for i in range(h):
        for j in range(w):
            cols.append(x_nhwc[:, i, j, :])         # (N, Cin)
            wrows.append(p0["w"][1 + i, 1 + j])     # (Cin, Cout) tap weight
    col = jnp.concatenate(cols, axis=-1).astype(jnp.bfloat16)   # (N, T*Cin)
    w0 = jnp.concatenate(wrows, axis=0).astype(jnp.bfloat16)    # (T*Cin, Cout)

    args = [col,
            w0, p0["b"].reshape(1, cout0),
            p0["gamma"].reshape(1, cout0), p0["beta"].reshape(1, cout0)]
    flops = 2 * n * h * w * cin * cout0
    trans = cout0
    for p in conv_params[1:]:
        ci, co = p["w"].shape[2], p["w"].shape[3]
        args += [p["w"][1, 1].astype(jnp.bfloat16),   # only the center tap matters
                 p["b"].reshape(1, co),
                 p["gamma"].reshape(1, co),
                 p["beta"].reshape(1, co)]
        flops += 2 * n * ci * co
        trans += co
    args += [dense_w.astype(jnp.bfloat16), dense_b.reshape(1, nb_classes)]
    flops += 2 * n * dense_w.shape[0] * nb_classes

    return pl.pallas_call(
        make_tail_kernel(len(conv_params)),
        grid=(1,),
        in_specs=[_full_spec(a.shape) for a in args],
        out_specs=_full_spec((n, nb_classes)),
        out_shape=jax.ShapeDtypeStruct((n, nb_classes), jnp.float32),
        compiler_params=pltpu.CompilerParams(
            dimension_semantics=("arbitrary",)),
        cost_estimate=pl.CostEstimate(
            flops=flops, transcendentals=trans,
            bytes_accessed=_bytes(*args) + n * nb_classes * 4),
    )(*args)


def dense_fallback(x_nhwc, dense_w, dense_b):
    """Generic path (final spatial > 1): fold the NCHW flatten order into the
    dense weight (weight-side permute) and run a single dense kernel."""
    n, h, w, c = x_nhwc.shape
    nb_classes = dense_w.shape[-1]
    wd = (dense_w.reshape(c, h, w, nb_classes)
          .transpose(1, 2, 0, 3)
          .reshape(h * w * c, nb_classes)).astype(jnp.bfloat16)
    xf = x_nhwc.reshape(n, h * w * c).astype(jnp.bfloat16)
    b2 = dense_b.reshape(1, nb_classes)
    args = (xf, wd, b2)
    return pl.pallas_call(
        linear_kernel,
        grid=(1,),
        in_specs=[_full_spec(a.shape) for a in args],
        out_specs=_full_spec((n, nb_classes)),
        out_shape=jax.ShapeDtypeStruct((n, nb_classes), jnp.float32),
        cost_estimate=pl.CostEstimate(
            flops=2 * n * h * w * c * nb_classes, transcendentals=0,
            bytes_accessed=_bytes(*args) + n * nb_classes * 4),
    )(*args)


# --------------------------------------------------------------------------
# Model: parameter init + forward
# --------------------------------------------------------------------------
def init_params(key, image_sizes, nb_classes):
    params = {"convs": []}
    for cin, cout in zip(CHANNELS[:-1], CHANNELS[1:]):
        key, kw_, kb_, kg_, kbt_ = jax.random.split(key, 5)
        fan_in = 3 * 3 * cin
        scale = 1.0 / jnp.sqrt(fan_in)
        params["convs"].append(
            dict(
                w=jax.random.uniform(
                    kw_, (3, 3, cin, cout), jnp.float32, -scale, scale),
                b=jax.random.uniform(kb_, (cout,), jnp.float32, -scale, scale),
                gamma=1.0 + 0.1 * jax.random.normal(kg_, (cout,), jnp.float32),
                beta=0.1 * jax.random.normal(kbt_, (cout,), jnp.float32),
            )
        )
    # feature-extractor output size: each conv "halves" spatial dims (ceil)
    h, w = image_sizes
    for _ in range(len(CHANNELS) - 1):
        h = (h + 2 - 3) // 2 + 1
        w = (w + 2 - 3) // 2 + 1
    fe_output = CHANNELS[-1] * h * w
    key, kw_, kb_ = jax.random.split(key, 3)
    scale = 1.0 / jnp.sqrt(fe_output)
    params["dense_w"] = jax.random.uniform(
        kw_, (fe_output, nb_classes), jnp.float32, -scale, scale)
    params["dense_b"] = jax.random.uniform(
        kb_, (nb_classes,), jnp.float32, -scale, scale)
    return params


@jax.jit
def cnn_forward(params, x_nchw):
    # NCHW (PyTorch convention) -> NHWC for the conv kernels
    x = jnp.transpose(x_nchw, (0, 2, 3, 1))
    convs = params["convs"]
    idx = 0
    # spatial conv blocks (one fused kernel each) until the map is <= 2x2
    while idx < len(convs) and (x.shape[1] > 2 or x.shape[2] > 2):
        x = conv_block_spatial(x, convs[idx])
        idx += 1
    if idx < len(convs):
        # remaining conv blocks (all 1x1 outputs) + Linear fused into ONE kernel;
        # final spatial is 1x1 so NHWC/NCHW flatten orders coincide.
        return fused_tail(x, convs[idx:], params["dense_w"], params["dense_b"])
    # generic fallback: NCHW flatten order folded into the dense weight
    return dense_fallback(x, params["dense_w"], params["dense_b"])


# --------------------------------------------------------------------------
if __name__ == "__main__":
    key = jax.random.PRNGKey(0)
    image_sizes = (16, 16)
    nb_classes = 10
    batch = 2

    key, kp, kx = jax.random.split(key, 3)
    params = init_params(kp, image_sizes, nb_classes)
    x = jax.random.normal(kx, (batch, 3, *image_sizes), jnp.float32)  # NCHW

    logits = cnn_forward(params, x)
    jax.block_until_ready(logits)
    assert logits.shape == (batch, nb_classes), logits.shape
    print("KERNEL_OK")
</pallas_src>

<mosaic_0001>
module attributes {stable_mosaic.version = 11 : i64} {
  func.func @conv_block_kernel(%arg0: i32, %arg1: memref<128x27xbf16, #tpu.memory_space<vmem>>, %arg2: memref<27x32xbf16, #tpu.memory_space<vmem>>, %arg3: memref<1x32xf32, #tpu.memory_space<vmem>>, %arg4: memref<1x32xf32, #tpu.memory_space<vmem>>, %arg5: memref<1x32xf32, #tpu.memory_space<vmem>>, %arg6: memref<128x32xf32, #tpu.memory_space<vmem>>) attributes {dimension_semantics = [#tpu.dimension_semantics<arbitrary>], iteration_bounds = array<i64: 1>, scalar_prefetch = 0 : i64, scratch_operands = 0 : i64, tpu.core_type = #tpu.core_type<tc>, window_params = [{pipeline_mode = #tpu.pipeline_mode<synchronous>, transform_indices = @transform_0, window_bounds = array<i64: 128, 27>}, {pipeline_mode = #tpu.pipeline_mode<synchronous>, transform_indices = @transform_1, window_bounds = array<i64: 27, 32>}, {pipeline_mode = #tpu.pipeline_mode<synchronous>, transform_indices = @transform_2, window_bounds = array<i64: 1, 32>}, {pipeline_mode = #tpu.pipeline_mode<synchronous>, transform_indices = @transform_3, window_bounds = array<i64: 1, 32>}, {pipeline_mode = #tpu.pipeline_mode<synchronous>, transform_indices = @transform_4, window_bounds = array<i64: 1, 32>}, {pipeline_mode = #tpu.pipeline_mode<synchronous>, transform_indices = @transform_5, window_bounds = array<i64: 128, 32>}]} {
    %c0 = arith.constant 0 : index
    %c0_0 = arith.constant 0 : index
    %0 = vector.load %arg1[%c0, %c0_0] : memref<128x27xbf16, #tpu.memory_space<vmem>>, vector<128x27xbf16>
    %c0_1 = arith.constant 0 : index
    %c0_2 = arith.constant 0 : index
    %1 = vector.load %arg2[%c0_1, %c0_2] : memref<27x32xbf16, #tpu.memory_space<vmem>>, vector<27x32xbf16>
    %cst = arith.constant dense<0.000000e+00> : vector<128x32xf32>
    %2 = tpu.matmul %0, %1, %cst {dimension_numbers = #tpu.dot_dimension_numbers<[1], [0], [0], [1], [0, 0, 1, 1], [], []>} : vector<128x27xbf16>, vector<27x32xbf16>, vector<128x32xf32> -> vector<128x32xf32>
    %c0_3 = arith.constant 0 : index
    %c0_4 = arith.constant 0 : index
    %3 = vector.load %arg3[%c0_3, %c0_4] : memref<1x32xf32, #tpu.memory_space<vmem>>, vector<1x32xf32>
    %c0_5 = arith.constant 0 : index
    %c0_6 = arith.constant 0 : index
    %4 = vector.load %arg4[%c0_5, %c0_6] : memref<1x32xf32, #tpu.memory_space<vmem>>, vector<1x32xf32>
    %c0_7 = arith.constant 0 : index
    %c0_8 = arith.constant 0 : index
    %5 = vector.load %arg5[%c0_7, %c0_8] : memref<1x32xf32, #tpu.memory_space<vmem>>, vector<1x32xf32>
    %6 = vector.broadcast %3 : vector<1x32xf32> to vector<128x32xf32>
    %7 = arith.addf %2, %6 : vector<128x32xf32>
    %cst_9 = arith.constant 0.000000e+00 : f32
    %8 = vector.broadcast %cst_9 : f32 to vector<128x32xf32>
    %9 = arith.maximumf %7, %8 : vector<128x32xf32>
    %cst_10 = arith.constant dense<0.000000e+00> : vector<32xf32>
    %10 = vector.multi_reduction <add>, %9, %cst_10 [0] : vector<128x32xf32> to vector<32xf32>
    %11 = vector.shape_cast %10 : vector<32xf32> to vector<1x32xf32>
    %cst_11 = arith.constant 1.280000e+02 : f32
    %12 = vector.broadcast %cst_11 : f32 to vector<1x32xf32>
    %13 = arith.divf %11, %12 : vector<1x32xf32>
    %14 = arith.mulf %9, %9 : vector<128x32xf32>
    %cst_12 = arith.constant dense<0.000000e+00> : vector<32xf32>
    %15 = vector.multi_reduction <add>, %14, %cst_12 [0] : vector<128x32xf32> to vector<32xf32>
    %16 = vector.shape_cast %15 : vector<32xf32> to vector<1x32xf32>
    %cst_13 = arith.constant 1.280000e+02 : f32
    %17 = vector.broadcast %cst_13 : f32 to vector<1x32xf32>
    %18 = arith.divf %16, %17 : vector<1x32xf32>
    %19 = arith.mulf %13, %13 : vector<1x32xf32>
    %20 = arith.subf %18, %19 : vector<1x32xf32>
    %cst_14 = arith.constant 0.000000e+00 : f32
    %21 = vector.broadcast %cst_14 : f32 to vector<1x32xf32>
    %22 = arith.maximumf %20, %21 : vector<1x32xf32>
    %cst_15 = arith.constant 9.99999974E-6 : f32
    %23 = vector.broadcast %cst_15 : f32 to vector<1x32xf32>
    %24 = arith.addf %22, %23 : vector<1x32xf32>
    %25 = math.rsqrt %24 : vector<1x32xf32>
    %26 = vector.broadcast %13 : vector<1x32xf32> to vector<128x32xf32>
    %27 = arith.subf %9, %26 : vector<128x32xf32>
    %28 = vector.broadcast %25 : vector<1x32xf32> to vector<128x32xf32>
    %29 = arith.mulf %27, %28 : vector<128x32xf32>
    %30 = vector.broadcast %4 : vector<1x32xf32> to vector<128x32xf32>
    %31 = arith.mulf %29, %30 : vector<128x32xf32>
    %32 = vector.broadcast %5 : vector<1x32xf32> to vector<128x32xf32>
    %33 = arith.addf %31, %32 : vector<128x32xf32>
    %c0_16 = arith.constant 0 : index
    %c0_17 = arith.constant 0 : index
    %34 = vector.load %arg6[%c0_16, %c0_17] : memref<128x32xf32, #tpu.memory_space<vmem>>, vector<128x32xf32>
    tpu.vector_store %arg6[%c0_16, %c0_17], %33 {strides = array<i32>} : memref<128x32xf32, #tpu.memory_space<vmem>>, vector<128x32xf32>,
    return
  }
  func.func @transform_0(%arg0: i32) -> (i32, i32) {
    %c0_i32 = arith.constant 0 : i32
    %c0_i32_0 = arith.constant 0 : i32
    %c0_i32_1 = arith.constant 0 : i32
    return %c0_i32, %c0_i32_0 : i32, i32
  }
  func.func @transform_1(%arg0: i32) -> (i32, i32) {
    %c0_i32 = arith.constant 0 : i32
    %c0_i32_0 = arith.constant 0 : i32
    %c0_i32_1 = arith.constant 0 : i32
    return %c0_i32, %c0_i32_0 : i32, i32
  }
  func.func @transform_2(%arg0: i32) -> (i32, i32) {
    %c0_i32 = arith.constant 0 : i32
    %c0_i32_0 = arith.constant 0 : i32
    %c0_i32_1 = arith.constant 0 : i32
    return %c0_i32, %c0_i32_0 : i32, i32
  }
  func.func @transform_3(%arg0: i32) -> (i32, i32) {
    %c0_i32 = arith.constant 0 : i32
    %c0_i32_0 = arith.constant 0 : i32
    %c0_i32_1 = arith.constant 0 : i32
    return %c0_i32, %c0_i32_0 : i32, i32
  }
  func.func @transform_4(%arg0: i32) -> (i32, i32) {
    %c0_i32 = arith.constant 0 : i32
    %c0_i32_0 = arith.constant 0 : i32
    %c0_i32_1 = arith.constant 0 : i32
    return %c0_i32, %c0_i32_0 : i32, i32
  }
  func.func @transform_5(%arg0: i32) -> (i32, i32) {
    %c0_i32 = arith.constant 0 : i32
    %c0_i32_0 = arith.constant 0 : i32
    %c0_i32_1 = arith.constant 0 : i32
    return %c0_i32, %c0_i32_0 : i32, i32
  }
}

module attributes {stable_mosaic.version = 11 : i64} {
  func.func @conv_block_kernel(%arg0: i32, %arg1: memref<32x288xbf16, #tpu.memory_space<vmem>>, %arg2: memref<288x64xbf16, #tpu.memory_space<vmem>>, %arg3: memref<1x64xf32, #tpu.memory_space<vmem>>, %arg4: memref<1x64xf32, #tpu.memory_space<vmem>>, %arg5: memref<1x64xf32, #tpu.memory_space<vmem>>, %arg6: memref<32x64xf32, #tpu.memory_space<vmem>>) attributes {dimension_semantics = [#tpu.dimension_semantics<arbitrary>], iteration_bounds = array<i64: 1>, scalar_prefetch = 0 : i64, scratch_operands = 0 : i64, tpu.core_type = #tpu.core_type<tc>, window_params = [{pipeline_mode = #tpu.pipeline_mode<synchronous>, transform_indices = @transform_0, window_bounds = array<i64: 32, 288>}, {pipeline_mode = #tpu.pipeline_mode<synchronous>, transform_indices = @transform_1, window_bounds = array<i64: 288, 64>}, {pipeline_mode = #tpu.pipeline_mode<synchronous>, transform_indices = @transform_2, window_bounds = array<i64: 1, 64>}, {pipeline_mode = #tpu.pipeline_mode<synchronous>, transform_indices = @transform_3, window_bounds = array<i64: 1, 64>}, {pipeline_mode = #tpu.pipeline_mode<synchronous>, transform_indices = @transform_4, window_bounds = array<i64: 1, 64>}, {pipeline_mode = #tpu.pipeline_mode<synchronous>, transform_indices = @transform_5, window_bounds = array<i64: 32, 64>}]} {
    %c0 = arith.constant 0 : index
    %c0_0 = arith.constant 0 : index
    %0 = vector.load %arg1[%c0, %c0_0] : memref<32x288xbf16, #tpu.memory_space<vmem>>, vector<32x288xbf16>
    %c0_1 = arith.constant 0 : index
    %c0_2 = arith.constant 0 : index
    %1 = vector.load %arg2[%c0_1, %c0_2] : memref<288x64xbf16, #tpu.memory_space<vmem>>, vector<288x64xbf16>
    %cst = arith.constant dense<0.000000e+00> : vector<32x64xf32>
    %2 = tpu.matmul %0, %1, %cst {dimension_numbers = #tpu.dot_dimension_numbers<[1], [0], [0], [1], [0, 0, 1, 1], [], []>} : vector<32x288xbf16>, vector<288x64xbf16>, vector<32x64xf32> -> vector<32x64xf32>
    %c0_3 = arith.constant 0 : index
    %c0_4 = arith.constant 0 : index
    %3 = vector.load %arg3[%c0_3, %c0_4] : memref<1x64xf32, #tpu.memory_space<vmem>>, vector<1x64xf32>
    %c0_5 = arith.constant 0 : index
    %c0_6 = arith.constant 0 : index
    %4 = vector.load %arg4[%c0_5, %c0_6] : memref<1x64xf32, #tpu.memory_space<vmem>>, vector<1x64xf32>
    %c0_7 = arith.constant 0 : index
    %c0_8 = arith.constant 0 : index
    %5 = vector.load %arg5[%c0_7, %c0_8] : memref<1x64xf32, #tpu.memory_space<vmem>>, vector<1x64xf32>
    %6 = vector.broadcast %3 : vector<1x64xf32> to vector<32x64xf32>
    %7 = arith.addf %2, %6 : vector<32x64xf32>
    %cst_9 = arith.constant 0.000000e+00 : f32
    %8 = vector.broadcast %cst_9 : f32 to vector<32x64xf32>
    %9 = arith.maximumf %7, %8 : vector<32x64xf32>
    %cst_10 = arith.constant dense<0.000000e+00> : vector<64xf32>
    %10 = vector.multi_reduction <add>, %9, %cst_10 [0] : vector<32x64xf32> to vector<64xf32>
    %11 = vector.shape_cast %10 : vector<64xf32> to vector<1x64xf32>
    %cst_11 = arith.constant 3.200000e+01 : f32
    %12 = vector.broadcast %cst_11 : f32 to vector<1x64xf32>
    %13 = arith.divf %11, %12 : vector<1x64xf32>
    %14 = arith.mulf %9, %9 : vector<32x64xf32>
    %cst_12 = arith.constant dense<0.000000e+00> : vector<64xf32>
    %15 = vector.multi_reduction <add>, %14, %cst_12 [0] : vector<32x64xf32> to vector<64xf32>
    %16 = vector.shape_cast %15 : vector<64xf32> to vector<1x64xf32>
    %cst_13 = arith.constant 3.200000e+01 : f32
    %17 = vector.broadcast %cst_13 : f32 to vector<1x64xf32>
    %18 = arith.divf %16, %17 : vector<1x64xf32>
    %19 = arith.mulf %13, %13 : vector<1x64xf32>
    %20 = arith.subf %18, %19 : vector<1x64xf32>
    %cst_14 = arith.constant 0.000000e+00 : f32
    %21 = vector.broadcast %cst_14 : f32 to vector<1x64xf32>
    %22 = arith.maximumf %20, %21 : vector<1x64xf32>
    %cst_15 = arith.constant 9.99999974E-6 : f32
    %23 = vector.broadcast %cst_15 : f32 to vector<1x64xf32>
    %24 = arith.addf %22, %23 : vector<1x64xf32>
    %25 = math.rsqrt %24 : vector<1x64xf32>
    %26 = vector.broadcast %13 : vector<1x64xf32> to vector<32x64xf32>
    %27 = arith.subf %9, %26 : vector<32x64xf32>
    %28 = vector.broadcast %25 : vector<1x64xf32> to vector<32x64xf32>
    %29 = arith.mulf %27, %28 : vector<32x64xf32>
    %30 = vector.broadcast %4 : vector<1x64xf32> to vector<32x64xf32>
    %31 = arith.mulf %29, %30 : vector<32x64xf32>
    %32 = vector.broadcast %5 : vector<1x64xf32> to vector<32x64xf32>
    %33 = arith.addf %31, %32 : vector<32x64xf32>
    %c0_16 = arith.constant 0 : index
    %c0_17 = arith.constant 0 : index
    %34 = vector.load %arg6[%c0_16, %c0_17] : memref<32x64xf32, #tpu.memory_space<vmem>>, vector<32x64xf32>
    tpu.vector_store %arg6[%c0_16, %c0_17], %33 {strides = array<i32>} : memref<32x64xf32, #tpu.memory_space<vmem>>, vector<32x64xf32>,
    return
  }
  func.func @transform_0(%arg0: i32) -> (i32, i32) {
    %c0_i32 = arith.constant 0 : i32
    %c0_i32_0 = arith.constant 0 : i32
    %c0_i32_1 = arith.constant 0 : i32
    return %c0_i32, %c0_i32_0 : i32, i32
  }
  func.func @transform_1(%arg0: i32) -> (i32, i32) {
    %c0_i32 = arith.constant 0 : i32
    %c0_i32_0 = arith.constant 0 : i32
    %c0_i32_1 = arith.constant 0 : i32
    return %c0_i32, %c0_i32_0 : i32, i32
  }
  func.func @transform_2(%arg0: i32) -> (i32, i32) {
    %c0_i32 = arith.constant 0 : i32
    %c0_i32_0 = arith.constant 0 : i32
    %c0_i32_1 = arith.constant 0 : i32
    return %c0_i32, %c0_i32_0 : i32, i32
  }
  func.func @transform_3(%arg0: i32) -> (i32, i32) {
    %c0_i32 = arith.constant 0 : i32
    %c0_i32_0 = arith.constant 0 : i32
    %c0_i32_1 = arith.constant 0 : i32
    return %c0_i32, %c0_i32_0 : i32, i32
  }
  func.func @transform_4(%arg0: i32) -> (i32, i32) {
    %c0_i32 = arith.constant 0 : i32
    %c0_i32_0 = arith.constant 0 : i32
    %c0_i32_1 = arith.constant 0 : i32
    return %c0_i32, %c0_i32_0 : i32, i32
  }
  func.func @transform_5(%arg0: i32) -> (i32, i32) {
    %c0_i32 = arith.constant 0 : i32
    %c0_i32_0 = arith.constant 0 : i32
    %c0_i32_1 = arith.constant 0 : i32
    return %c0_i32, %c0_i32_0 : i32, i32
  }
}

module attributes {stable_mosaic.version = 11 : i64} {
  func.func @conv_block_kernel(%arg0: i32, %arg1: memref<8x576xbf16, #tpu.memory_space<vmem>>, %arg2: memref<576x128xbf16, #tpu.memory_space<vmem>>, %arg3: memref<1x128xf32, #tpu.memory_space<vmem>>, %arg4: memref<1x128xf32, #tpu.memory_space<vmem>>, %arg5: memref<1x128xf32, #tpu.memory_space<vmem>>, %arg6: memref<8x128xf32, #tpu.memory_space<vmem>>) attributes {dimension_semantics = [#tpu.dimension_semantics<arbitrary>], iteration_bounds = array<i64: 1>, scalar_prefetch = 0 : i64, scratch_operands = 0 : i64, tpu.core_type = #tpu.core_type<tc>, window_params = [{pipeline_mode = #tpu.pipeline_mode<synchronous>, transform_indices = @transform_0, window_bounds = array<i64: 8, 576>}, {pipeline_mode = #tpu.pipeline_mode<synchronous>, transform_indices = @transform_1, window_bounds = array<i64: 576, 128>}, {pipeline_mode = #tpu.pipeline_mode<synchronous>, transform_indices = @transform_2, window_bounds = array<i64: 1, 128>}, {pipeline_mode = #tpu.pipeline_mode<synchronous>, transform_indices = @transform_3, window_bounds = array<i64: 1, 128>}, {pipeline_mode = #tpu.pipeline_mode<synchronous>, transform_indices = @transform_4, window_bounds = array<i64: 1, 128>}, {pipeline_mode = #tpu.pipeline_mode<synchronous>, transform_indices = @transform_5, window_bounds = array<i64: 8, 128>}]} {
    %c0 = arith.constant 0 : index
    %c0_0 = arith.constant 0 : index
    %0 = vector.load %arg1[%c0, %c0_0] : memref<8x576xbf16, #tpu.memory_space<vmem>>, vector<8x576xbf16>
    %c0_1 = arith.constant 0 : index
    %c0_2 = arith.constant 0 : index
    %1 = vector.load %arg2[%c0_1, %c0_2] : memref<576x128xbf16, #tpu.memory_space<vmem>>, vector<576x128xbf16>
    %cst = arith.constant dense<0.000000e+00> : vector<8x128xf32>
    %2 = tpu.matmul %0, %1, %cst {dimension_numbers = #tpu.dot_dimension_numbers<[1], [0], [0], [1], [0, 0, 1, 1], [], []>} : vector<8x576xbf16>, vector<576x128xbf16>, vector<8x128xf32> -> vector<8x128xf32>
    %c0_3 = arith.constant 0 : index
    %c0_4 = arith.constant 0 : index
    %3 = vector.load %arg3[%c0_3, %c0_4] : memref<1x128xf32, #tpu.memory_space<vmem>>, vector<1x128xf32>
    %c0_5 = arith.constant 0 : index
    %c0_6 = arith.constant 0 : index
    %4 = vector.load %arg4[%c0_5, %c0_6] : memref<1x128xf32, #tpu.memory_space<vmem>>, vector<1x128xf32>
    %c0_7 = arith.constant 0 : index
    %c0_8 = arith.constant 0 : index
    %5 = vector.load %arg5[%c0_7, %c0_8] : memref<1x128xf32, #tpu.memory_space<vmem>>, vector<1x128xf32>
    %6 = vector.broadcast %3 : vector<1x128xf32> to vector<8x128xf32>
    %7 = arith.addf %2, %6 : vector<8x128xf32>
    %cst_9 = arith.constant 0.000000e+00 : f32
    %8 = vector.broadcast %cst_9 : f32 to vector<8x128xf32>
    %9 = arith.maximumf %7, %8 : vector<8x128xf32>
    %cst_10 = arith.constant dense<0.000000e+00> : vector<128xf32>
    %10 = vector.multi_reduction <add>, %9, %cst_10 [0] : vector<8x128xf32> to vector<128xf32>
    %11 = vector.shape_cast %10 : vector<128xf32> to vector<1x128xf32>
    %cst_11 = arith.constant 8.000000e+00 : f32
    %12 = vector.broadcast %cst_11 : f32 to vector<1x128xf32>
    %13 = arith.divf %11, %12 : vector<1x128xf32>
    %14 = arith.mulf %9, %9 : vector<8x128xf32>
    %cst_12 = arith.constant dense<0.000000e+00> : vector<128xf32>
    %15 = vector.multi_reduction <add>, %14, %cst_12 [0] : vector<8x128xf32> to vector<128xf32>
    %16 = vector.shape_cast %15 : vector<128xf32> to vector<1x128xf32>
    %cst_13 = arith.constant 8.000000e+00 : f32
    %17 = vector.broadcast %cst_13 : f32 to vector<1x128xf32>
    %18 = arith.divf %16, %17 : vector<1x128xf32>
    %19 = arith.mulf %13, %13 : vector<1x128xf32>
    %20 = arith.subf %18, %19 : vector<1x128xf32>
    %cst_14 = arith.constant 0.000000e+00 : f32
    %21 = vector.broadcast %cst_14 : f32 to vector<1x128xf32>
    %22 = arith.maximumf %20, %21 : vector<1x128xf32>
    %cst_15 = arith.constant 9.99999974E-6 : f32
    %23 = vector.broadcast %cst_15 : f32 to vector<1x128xf32>
    %24 = arith.addf %22, %23 : vector<1x128xf32>
    %25 = math.rsqrt %24 : vector<1x128xf32>
    %26 = vector.broadcast %13 : vector<1x128xf32> to vector<8x128xf32>
    %27 = arith.subf %9, %26 : vector<8x128xf32>
    %28 = vector.broadcast %25 : vector<1x128xf32> to vector<8x128xf32>
    %29 = arith.mulf %27, %28 : vector<8x128xf32>
    %30 = vector.broadcast %4 : vector<1x128xf32> to vector<8x128xf32>
    %31 = arith.mulf %29, %30 : vector<8x128xf32>
    %32 = vector.broadcast %5 : vector<1x128xf32> to vector<8x128xf32>
    %33 = arith.addf %31, %32 : vector<8x128xf32>
    %c0_16 = arith.constant 0 : index
    %c0_17 = arith.constant 0 : index
    %34 = vector.load %arg6[%c0_16, %c0_17] : memref<8x128xf32, #tpu.memory_space<vmem>>, vector<8x128xf32>
    tpu.vector_store %arg6[%c0_16, %c0_17], %33 {strides = array<i32>} : memref<8x128xf32, #tpu.memory_space<vmem>>, vector<8x128xf32>,
    return
  }
  func.func @transform_0(%arg0: i32) -> (i32, i32) {
    %c0_i32 = arith.constant 0 : i32
    %c0_i32_0 = arith.constant 0 : i32
    %c0_i32_1 = arith.constant 0 : i32
    return %c0_i32, %c0_i32_0 : i32, i32
  }
  func.func @transform_1(%arg0: i32) -> (i32, i32) {
    %c0_i32 = arith.constant 0 : i32
    %c0_i32_0 = arith.constant 0 : i32
    %c0_i32_1 = arith.constant 0 : i32
    return %c0_i32, %c0_i32_0 : i32, i32
  }
  func.func @transform_2(%arg0: i32) -> (i32, i32) {
    %c0_i32 = arith.constant 0 : i32
    %c0_i32_0 = arith.constant 0 : i32
    %c0_i32_1 = arith.constant 0 : i32
    return %c0_i32, %c0_i32_0 : i32, i32
  }
  func.func @transform_3(%arg0: i32) -> (i32, i32) {
    %c0_i32 = arith.constant 0 : i32
    %c0_i32_0 = arith.constant 0 : i32
    %c0_i32_1 = arith.constant 0 : i32
    return %c0_i32, %c0_i32_0 : i32, i32
  }
  func.func @transform_4(%arg0: i32) -> (i32, i32) {
    %c0_i32 = arith.constant 0 : i32
    %c0_i32_0 = arith.constant 0 : i32
    %c0_i32_1 = arith.constant 0 : i32
    return %c0_i32, %c0_i32_0 : i32, i32
  }
  func.func @transform_5(%arg0: i32) -> (i32, i32) {
    %c0_i32 = arith.constant 0 : i32
    %c0_i32_0 = arith.constant 0 : i32
    %c0_i32_1 = arith.constant 0 : i32
    return %c0_i32, %c0_i32_0 : i32, i32
  }
}

module attributes {stable_mosaic.version = 11 : i64} {
  func.func @kernel(%arg0: i32, %arg1: memref<2x512xbf16, #tpu.memory_space<vmem>>, %arg2: memref<512x256xbf16, #tpu.memory_space<vmem>>, %arg3: memref<1x256xf32, #tpu.memory_space<vmem>>, %arg4: memref<1x256xf32, #tpu.memory_space<vmem>>, %arg5: memref<1x256xf32, #tpu.memory_space<vmem>>, %arg6: memref<256x128xbf16, #tpu.memory_space<vmem>>, %arg7: memref<1x128xf32, #tpu.memory_space<vmem>>, %arg8: memref<1x128xf32, #tpu.memory_space<vmem>>, %arg9: memref<1x128xf32, #tpu.memory_space<vmem>>, %arg10: memref<128x64xbf16, #tpu.memory_space<vmem>>, %arg11: memref<1x64xf32, #tpu.memory_space<vmem>>, %arg12: memref<1x64xf32, #tpu.memory_space<vmem>>, %arg13: memref<1x64xf32, #tpu.memory_space<vmem>>, %arg14: memref<64x32xbf16, #tpu.memory_space<vmem>>, %arg15: memref<1x32xf32, #tpu.memory_space<vmem>>, %arg16: memref<1x32xf32, #tpu.memory_space<vmem>>, %arg17: memref<1x32xf32, #tpu.memory_space<vmem>>, %arg18: memref<32x10xbf16, #tpu.memory_space<vmem>>, %arg19: memref<1x10xf32, #tpu.memory_space<vmem>>, %arg20: memref<2x10xf32, #tpu.memory_space<vmem>>) attributes {dimension_semantics = [#tpu.dimension_semantics<arbitrary>], iteration_bounds = array<i64: 1>, scalar_prefetch = 0 : i64, scratch_operands = 0 : i64, tpu.core_type = #tpu.core_type<tc>, window_params = [{pipeline_mode = #tpu.pipeline_mode<synchronous>, transform_indices = @transform_0, window_bounds = array<i64: 2, 512>}, {pipeline_mode = #tpu.pipeline_mode<synchronous>, transform_indices = @transform_1, window_bounds = array<i64: 512, 256>}, {pipeline_mode = #tpu.pipeline_mode<synchronous>, transform_indices = @transform_2, window_bounds = array<i64: 1, 256>}, {pipeline_mode = #tpu.pipeline_mode<synchronous>, transform_indices = @transform_3, window_bounds = array<i64: 1, 256>}, {pipeline_mode = #tpu.pipeline_mode<synchronous>, transform_indices = @transform_4, window_bounds = array<i64: 1, 256>}, {pipeline_mode = #tpu.pipeline_mode<synchronous>, transform_indices = @transform_5, window_bounds = array<i64: 256, 128>}, {pipeline_mode = #tpu.pipeline_mode<synchronous>, transform_indices = @transform_6, window_bounds = array<i64: 1, 128>}, {pipeline_mode = #tpu.pipeline_mode<synchronous>, transform_indices = @transform_7, window_bounds = array<i64: 1, 128>}, {pipeline_mode = #tpu.pipeline_mode<synchronous>, transform_indices = @transform_8, window_bounds = array<i64: 1, 128>}, {pipeline_mode = #tpu.pipeline_mode<synchronous>, transform_indices = @transform_9, window_bounds = array<i64: 128, 64>}, {pipeline_mode = #tpu.pipeline_mode<synchronous>, transform_indices = @transform_10, window_bounds = array<i64: 1, 64>}, {pipeline_mode = #tpu.pipeline_mode<synchronous>, transform_indices = @transform_11, window_bounds = array<i64: 1, 64>}, {pipeline_mode = #tpu.pipeline_mode<synchronous>, transform_indices = @transform_12, window_bounds = array<i64: 1, 64>}, {pipeline_mode = #tpu.pipeline_mode<synchronous>, transform_indices = @transform_13, window_bounds = array<i64: 64, 32>}, {pipeline_mode = #tpu.pipeline_mode<synchronous>, transform_indices = @transform_14, window_bounds = array<i64: 1, 32>}, {pipeline_mode = #tpu.pipeline_mode<synchronous>, transform_indices = @transform_15, window_bounds = array<i64: 1, 32>}, {pipeline_mode = #tpu.pipeline_mode<synchronous>, transform_indices = @transform_16, window_bounds = array<i64: 1, 32>}, {pipeline_mode = #tpu.pipeline_mode<synchronous>, transform_indices = @transform_17, window_bounds = array<i64: 32, 10>}, {pipeline_mode = #tpu.pipeline_mode<synchronous>, transform_indices = @transform_18, window_bounds = array<i64: 1, 10>}, {pipeline_mode = #tpu.pipeline_mode<synchronous>, transform_indices = @transform_19, window_bounds = array<i64: 2, 10>}]} {
    %c0 = arith.constant 0 : index
    %c0_0 = arith.constant 0 : index
    %0 = vector.load %arg1[%c0, %c0_0] : memref<2x512xbf16, #tpu.memory_space<vmem>>, vector<2x512xbf16>
    %c0_1 = arith.constant 0 : index
    %c0_2 = arith.constant 0 : index
    %1 = vector.load %arg2[%c0_1, %c0_2] : memref<512x256xbf16, #tpu.memory_space<vmem>>, vector<512x256xbf16>
    %cst = arith.constant dense<0.000000e+00> : vector<2x256xf32>
    %2 = tpu.matmul %0, %1, %cst {dimension_numbers = #tpu.dot_dimension_numbers<[1], [0], [0], [1], [0, 0, 1, 1], [], []>} : vector<2x512xbf16>, vector<512x256xbf16>, vector<2x256xf32> -> vector<2x256xf32>
    %c0_3 = arith.constant 0 : index
    %c0_4 = arith.constant 0 : index
    %3 = vector.load %arg3[%c0_3, %c0_4] : memref<1x256xf32, #tpu.memory_space<vmem>>, vector<1x256xf32>
    %c0_5 = arith.constant 0 : index
    %c0_6 = arith.constant 0 : index
    %4 = vector.load %arg4[%c0_5, %c0_6] : memref<1x256xf32, #tpu.memory_space<vmem>>, vector<1x256xf32>
    %c0_7 = arith.constant 0 : index
    %c0_8 = arith.constant 0 : index
    %5 = vector.load %arg5[%c0_7, %c0_8] : memref<1x256xf32, #tpu.memory_space<vmem>>, vector<1x256xf32>
    %6 = vector.broadcast %3 : vector<1x256xf32> to vector<2x256xf32>
    %7 = arith.addf %2, %6 : vector<2x256xf32>
    %cst_9 = arith.constant 0.000000e+00 : f32
    %8 = vector.broadcast %cst_9 : f32 to vector<2x256xf32>
    %9 = arith.maximumf %7, %8 : vector<2x256xf32>
    %cst_10 = arith.constant dense<0.000000e+00> : vector<256xf32>
    %10 = vector.multi_reduction <add>, %9, %cst_10 [0] : vector<2x256xf32> to vector<256xf32>
    %11 = vector.shape_cast %10 : vector<256xf32> to vector<1x256xf32>
    %cst_11 = arith.constant 2.000000e+00 : f32
    %12 = vector.broadcast %cst_11 : f32 to vector<1x256xf32>
    %13 = arith.divf %11, %12 : vector<1x256xf32>
    %14 = arith.mulf %9, %9 : vector<2x256xf32>
    %cst_12 = arith.constant dense<0.000000e+00> : vector<256xf32>
    %15 = vector.multi_reduction <add>, %14, %cst_12 [0] : vector<2x256xf32> to vector<256xf32>
    %16 = vector.shape_cast %15 : vector<256xf32> to vector<1x256xf32>
    %cst_13 = arith.constant 2.000000e+00 : f32
    %17 = vector.broadcast %cst_13 : f32 to vector<1x256xf32>
    %18 = arith.divf %16, %17 : vector<1x256xf32>
    %19 = arith.mulf %13, %13 : vector<1x256xf32>
    %20 = arith.subf %18, %19 : vector<1x256xf32>
    %cst_14 = arith.constant 0.000000e+00 : f32
    %21 = vector.broadcast %cst_14 : f32 to vector<1x256xf32>
    %22 = arith.maximumf %20, %21 : vector<1x256xf32>
    %cst_15 = arith.constant 9.99999974E-6 : f32
    %23 = vector.broadcast %cst_15 : f32 to vector<1x256xf32>
    %24 = arith.addf %22, %23 : vector<1x256xf32>
    %25 = math.rsqrt %24 : vector<1x256xf32>
    %26 = vector.broadcast %13 : vector<1x256xf32> to vector<2x256xf32>
    %27 = arith.subf %9, %26 : vector<2x256xf32>
    %28 = vector.broadcast %25 : vector<1x256xf32> to vector<2x256xf32>
    %29 = arith.mulf %27, %28 : vector<2x256xf32>
    %30 = vector.broadcast %4 : vector<1x256xf32> to vector<2x256xf32>
    %31 = arith.mulf %29, %30 : vector<2x256xf32>
    %32 = vector.broadcast %5 : vector<1x256xf32> to vector<2x256xf32>
    %33 = arith.addf %31, %32 : vector<2x256xf32>
    %34 = arith.truncf %33 : vector<2x256xf32> to vector<2x256xbf16>
    %c0_16 = arith.constant 0 : index
    %c0_17 = arith.constant 0 : index
    %35 = vector.load %arg6[%c0_16, %c0_17] : memref<256x128xbf16, #tpu.memory_space<vmem>>, vector<256x128xbf16>
    %cst_18 = arith.constant dense<0.000000e+00> : vector<2x128xf32>
    %36 = tpu.matmul %34, %35, %cst_18 {dimension_numbers = #tpu.dot_dimension_numbers<[1], [0], [0], [1], [0, 0, 1, 1], [], []>} : vector<2x256xbf16>, vector<256x128xbf16>, vector<2x128xf32> -> vector<2x128xf32>
    %c0_19 = arith.constant 0 : index
    %c0_20 = arith.constant 0 : index
    %37 = vector.load %arg7[%c0_19, %c0_20] : memref<1x128xf32, #tpu.memory_space<vmem>>, vector<1x128xf32>
    %c0_21 = arith.constant 0 : index
    %c0_22 = arith.constant 0 : index
    %38 = vector.load %arg8[%c0_21, %c0_22] : memref<1x128xf32, #tpu.memory_space<vmem>>, vector<1x128xf32>
    %c0_23 = arith.constant 0 : index
    %c0_24 = arith.constant 0 : index
    %39 = vector.load %arg9[%c0_23, %c0_24] : memref<1x128xf32, #tpu.memory_space<vmem>>, vector<1x128xf32>
    %40 = vector.broadcast %37 : vector<1x128xf32> to vector<2x128xf32>
    %41 = arith.addf %36, %40 : vector<2x128xf32>
    %cst_25 = arith.constant 0.000000e+00 : f32
    %42 = vector.broadcast %cst_25 : f32 to vector<2x128xf32>
    %43 = arith.maximumf %41, %42 : vector<2x128xf32>
    %cst_26 = arith.constant dense<0.000000e+00> : vector<128xf32>
    %44 = vector.multi_reduction <add>, %43, %cst_26 [0] : vector<2x128xf32> to vector<128xf32>
    %45 = vector.shape_cast %44 : vector<128xf32> to vector<1x128xf32>
    %cst_27 = arith.constant 2.000000e+00 : f32
    %46 = vector.broadcast %cst_27 : f32 to vector<1x128xf32>
    %47 = arith.divf %45, %46 : vector<1x128xf32>
    %48 = arith.mulf %43, %43 : vector<2x128xf32>
    %cst_28 = arith.constant dense<0.000000e+00> : vector<128xf32>
    %49 = vector.multi_reduction <add>, %48, %cst_28 [0] : vector<2x128xf32> to vector<128xf32>
    %50 = vector.shape_cast %49 : vector<128xf32> to vector<1x128xf32>
    %cst_29 = arith.constant 2.000000e+00 : f32
    %51 = vector.broadcast %cst_29 : f32 to vector<1x128xf32>
    %52 = arith.divf %50, %51 : vector<1x128xf32>
    %53 = arith.mulf %47, %47 : vector<1x128xf32>
    %54 = arith.subf %52, %53 : vector<1x128xf32>
    %cst_30 = arith.constant 0.000000e+00 : f32
    %55 = vector.broadcast %cst_30 : f32 to vector<1x128xf32>
    %56 = arith.maximumf %54, %55 : vector<1x128xf32>
    %cst_31 = arith.constant 9.99999974E-6 : f32
    %57 = vector.broadcast %cst_31 : f32 to vector<1x128xf32>
    %58 = arith.addf %56, %57 : vector<1x128xf32>
    %59 = math.rsqrt %58 : vector<1x128xf32>
    %60 = vector.broadcast %47 : vector<1x128xf32> to vector<2x128xf32>
    %61 = arith.subf %43, %60 : vector<2x128xf32>
    %62 = vector.broadcast %59 : vector<1x128xf32> to vector<2x128xf32>
    %63 = arith.mulf %61, %62 : vector<2x128xf32>
    %64 = vector.broadcast %38 : vector<1x128xf32> to vector<2x128xf32>
    %65 = arith.mulf %63, %64 : vector<2x128xf32>
    %66 = vector.broadcast %39 : vector<1x128xf32> to vector<2x128xf32>
    %67 = arith.addf %65, %66 : vector<2x128xf32>
    %68 = arith.truncf %67 : vector<2x128xf32> to vector<2x128xbf16>
    %c0_32 = arith.constant 0 : index
    %c0_33 = arith.constant 0 : index
    %69 = vector.load %arg10[%c0_32, %c0_33] : memref<128x64xbf16, #tpu.memory_space<vmem>>, vector<128x64xbf16>
    %cst_34 = arith.constant dense<0.000000e+00> : vector<2x64xf32>
    %70 = tpu.matmul %68, %69, %cst_34 {dimension_numbers = #tpu.dot_dimension_numbers<[1], [0], [0], [1], [0, 0, 1, 1], [], []>} : vector<2x128xbf16>, vector<128x64xbf16>, vector<2x64xf32> -> vector<2x64xf32>
    %c0_35 = arith.constant 0 : index
    %c0_36 = arith.constant 0 : index
    %71 = vector.load %arg11[%c0_35, %c0_36] : memref<1x64xf32, #tpu.memory_space<vmem>>, vector<1x64xf32>
    %c0_37 = arith.constant 0 : index
    %c0_38 = arith.constant 0 : index
    %72 = vector.load %arg12[%c0_37, %c0_38] : memref<1x64xf32, #tpu.memory_space<vmem>>, vector<1x64xf32>
    %c0_39 = arith.constant 0 : index
    %c0_40 = arith.constant 0 : index
    %73 = vector.load %arg13[%c0_39, %c0_40] : memref<1x64xf32, #tpu.memory_space<vmem>>, vector<1x64xf32>
    %74 = vector.broadcast %71 : vector<1x64xf32> to vector<2x64xf32>
    %75 = arith.addf %70, %74 : vector<2x64xf32>
    %cst_41 = arith.constant 0.000000e+00 : f32
    %76 = vector.broadcast %cst_41 : f32 to vector<2x64xf32>
    %77 = arith.maximumf %75, %76 : vector<2x64xf32>
    %cst_42 = arith.constant dense<0.000000e+00> : vector<64xf32>
    %78 = vector.multi_reduction <add>, %77, %cst_42 [0] : vector<2x64xf32> to vector<64xf32>
    %79 = vector.shape_cast %78 : vector<64xf32> to vector<1x64xf32>
    %cst_43 = arith.constant 2.000000e+00 : f32
    %80 = vector.broadcast %cst_43 : f32 to vector<1x64xf32>
    %81 = arith.divf %79, %80 : vector<1x64xf32>
    %82 = arith.mulf %77, %77 : vector<2x64xf32>
    %cst_44 = arith.constant dense<0.000000e+00> : vector<64xf32>
    %83 = vector.multi_reduction <add>, %82, %cst_44 [0] : vector<2x64xf32> to vector<64xf32>
    %84 = vector.shape_cast %83 : vector<64xf32> to vector<1x64xf32>
    %cst_45 = arith.constant 2.000000e+00 : f32
    %85 = vector.broadcast %cst_45 : f32 to vector<1x64xf32>
    %86 = arith.divf %84, %85 : vector<1x64xf32>
    %87 = arith.mulf %81, %81 : vector<1x64xf32>
    %88 = arith.subf %86, %87 : vector<1x64xf32>
    %cst_46 = arith.constant 0.000000e+00 : f32
    %89 = vector.broadcast %cst_46 : f32 to vector<1x64xf32>
    %90 = arith.maximumf %88, %89 : vector<1x64xf32>
    %cst_47 = arith.constant 9.99999974E-6 : f32
    %91 = vector.broadcast %cst_47 : f32 to vector<1x64xf32>
    %92 = arith.addf %90, %91 : vector<1x64xf32>
    %93 = math.rsqrt %92 : vector<1x64xf32>
    %94 = vector.broadcast %81 : vector<1x64xf32> to vector<2x64xf32>
    %95 = arith.subf %77, %94 : vector<2x64xf32>
    %96 = vector.broadcast %93 : vector<1x64xf32> to vector<2x64xf32>
    %97 = arith.mulf %95, %96 : vector<2x64xf32>
    %98 = vector.broadcast %72 : vector<1x64xf32> to vector<2x64xf32>
    %99 = arith.mulf %97, %98 : vector<2x64xf32>
    %100 = vector.broadcast %73 : vector<1x64xf32> to vector<2x64xf32>
    %101 = arith.addf %99, %100 : vector<2x64xf32>
    %102 = arith.truncf %101 : vector<2x64xf32> to vector<2x64xbf16>
    %c0_48 = arith.constant 0 : index
    %c0_49 = arith.constant 0 : index
    %103 = vector.load %arg14[%c0_48, %c0_49] : memref<64x32xbf16, #tpu.memory_space<vmem>>, vector<64x32xbf16>
    %cst_50 = arith.constant dense<0.000000e+00> : vector<2x32xf32>
    %104 = tpu.matmul %102, %103, %cst_50 {dimension_numbers = #tpu.dot_dimension_numbers<[1], [0], [0], [1], [0, 0, 1, 1], [], []>} : vector<2x64xbf16>, vector<64x32xbf16>, vector<2x32xf32> -> vector<2x32xf32>
    %c0_51 = arith.constant 0 : index
    %c0_52 = arith.constant 0 : index
    %105 = vector.load %arg15[%c0_51, %c0_52] : memref<1x32xf32, #tpu.memory_space<vmem>>, vector<1x32xf32>
    %c0_53 = arith.constant 0 : index
    %c0_54 = arith.constant 0 : index
    %106 = vector.load %arg16[%c0_53, %c0_54] : memref<1x32xf32, #tpu.memory_space<vmem>>, vector<1x32xf32>
    %c0_55 = arith.constant 0 : index
    %c0_56 = arith.constant 0 : index
    %107 = vector.load %arg17[%c0_55, %c0_56] : memref<1x32xf32, #tpu.memory_space<vmem>>, vector<1x32xf32>
    %108 = vector.broadcast %105 : vector<1x32xf32> to vector<2x32xf32>
    %109 = arith.addf %104, %108 : vector<2x32xf32>
    %cst_57 = arith.constant 0.000000e+00 : f32
    %110 = vector.broadcast %cst_57 : f32 to vector<2x32xf32>
    %111 = arith.maximumf %109, %110 : vector<2x32xf32>
    %cst_58 = arith.constant dense<0.000000e+00> : vector<32xf32>
    %112 = vector.multi_reduction <add>, %111, %cst_58 [0] : vector<2x32xf32> to vector<32xf32>
    %113 = vector.shape_cast %112 : vector<32xf32> to vector<1x32xf32>
    %cst_59 = arith.constant 2.000000e+00 : f32
    %114 = vector.broadcast %cst_59 : f32 to vector<1x32xf32>
    %115 = arith.divf %113, %114 : vector<1x32xf32>
    %116 = arith.mulf %111, %111 : vector<2x32xf32>
    %cst_60 = arith.constant dense<0.000000e+00> : vector<32xf32>
    %117 = vector.multi_reduction <add>, %116, %cst_60 [0] : vector<2x32xf32> to vector<32xf32>
    %118 = vector.shape_cast %117 : vector<32xf32> to vector<1x32xf32>
    %cst_61 = arith.constant 2.000000e+00 : f32
    %119 = vector.broadcast %cst_61 : f32 to vector<1x32xf32>
    %120 = arith.divf %118, %119 : vector<1x32xf32>
    %121 = arith.mulf %115, %115 : vector<1x32xf32>
    %122 = arith.subf %120, %121 : vector<1x32xf32>
    %cst_62 = arith.constant 0.000000e+00 : f32
    %123 = vector.broadcast %cst_62 : f32 to vector<1x32xf32>
    %124 = arith.maximumf %122, %123 : vector<1x32xf32>
    %cst_63 = arith.constant 9.99999974E-6 : f32
    %125 = vector.broadcast %cst_63 : f32 to vector<1x32xf32>
    %126 = arith.addf %124, %125 : vector<1x32xf32>
    %127 = math.rsqrt %126 : vector<1x32xf32>
    %128 = vector.broadcast %115 : vector<1x32xf32> to vector<2x32xf32>
    %129 = arith.subf %111, %128 : vector<2x32xf32>
    %130 = vector.broadcast %127 : vector<1x32xf32> to vector<2x32xf32>
    %131 = arith.mulf %129, %130 : vector<2x32xf32>
    %132 = vector.broadcast %106 : vector<1x32xf32> to vector<2x32xf32>
    %133 = arith.mulf %131, %132 : vector<2x32xf32>
    %134 = vector.broadcast %107 : vector<1x32xf32> to vector<2x32xf32>
    %135 = arith.addf %133, %134 : vector<2x32xf32>
    %136 = arith.truncf %135 : vector<2x32xf32> to vector<2x32xbf16>
    %c0_64 = arith.constant 0 : index
    %c0_65 = arith.constant 0 : index
    %137 = vector.load %arg18[%c0_64, %c0_65] : memref<32x10xbf16, #tpu.memory_space<vmem>>, vector<32x10xbf16>
    %cst_66 = arith.constant dense<0.000000e+00> : vector<2x10xf32>
    %138 = tpu.matmul %136, %137, %cst_66 {dimension_numbers = #tpu.dot_dimension_numbers<[1], [0], [0], [1], [0, 0, 1, 1], [], []>} : vector<2x32xbf16>, vector<32x10xbf16>, vector<2x10xf32> -> vector<2x10xf32>
    %c0_67 = arith.constant 0 : index
    %c0_68 = arith.constant 0 : index
    %139 = vector.load %arg19[%c0_67, %c0_68] : memref<1x10xf32, #tpu.memory_space<vmem>>, vector<1x10xf32>
    %140 = vector.broadcast %139 : vector<1x10xf32> to vector<2x10xf32>
    %141 = arith.addf %138, %140 : vector<2x10xf32>
    %c0_69 = arith.constant 0 : index
    %c0_70 = arith.constant 0 : index
    %142 = vector.load %arg20[%c0_69, %c0_70] : memref<2x10xf32, #tpu.memory_space<vmem>>, vector<2x10xf32>
    tpu.vector_store %arg20[%c0_69, %c0_70], %141 {strides = array<i32>} : memref<2x10xf32, #tpu.memory_space<vmem>>, vector<2x10xf32>,
    return
  }
  func.func @transform_0(%arg0: i32) -> (i32, i32) {
    %c0_i32 = arith.constant 0 : i32
    %c0_i32_0 = arith.constant 0 : i32
    %c0_i32_1 = arith.constant 0 : i32
    return %c0_i32, %c0_i32_0 : i32, i32
  }
  func.func @transform_1(%arg0: i32) -> (i32, i32) {
    %c0_i32 = arith.constant 0 : i32
    %c0_i32_0 = arith.constant 0 : i32
    %c0_i32_1 = arith.constant 0 : i32
    return %c0_i32, %c0_i32_0 : i32, i32
  }
  func.func @transform_2(%arg0: i32) -> (i32, i32) {
    %c0_i32 = arith.constant 0 : i32
    %c0_i32_0 = arith.constant 0 : i32
    %c0_i32_1 = arith.constant 0 : i32
    return %c0_i32, %c0_i32_0 : i32, i32
  }
  func.func @transform_3(%arg0: i32) -> (i32, i32) {
    %c0_i32 = arith.constant 0 : i32
    %c0_i32_0 = arith.constant 0 : i32
    %c0_i32_1 = arith.constant 0 : i32
    return %c0_i32, %c0_i32_0 : i32, i32
  }
  func.func @transform_4(%arg0: i32) -> (i32, i32) {
    %c0_i32 = arith.constant 0 : i32
    %c0_i32_0 = arith.constant 0 : i32
    %c0_i32_1 = arith.constant 0 : i32
    return %c0_i32, %c0_i32_0 : i32, i32
  }
  func.func @transform_5(%arg0: i32) -> (i32, i32) {
    %c0_i32 = arith.constant 0 : i32
    %c0_i32_0 = arith.constant 0 : i32
    %c0_i32_1 = arith.constant 0 : i32
    return %c0_i32, %c0_i32_0 : i32, i32
  }
  func.func @transform_6(%arg0: i32) -> (i32, i32) {
    %c0_i32 = arith.constant 0 : i32
    %c0_i32_0 = arith.constant 0 : i32
    %c0_i32_1 = arith.constant 0 : i32
    return %c0_i32, %c0_i32_0 : i32, i32
  }
  func.func @transform_7(%arg0: i32) -> (i32, i32) {
    %c0_i32 = arith.constant 0 : i32
    %c0_i32_0 = arith.constant 0 : i32
    %c0_i32_1 = arith.constant 0 : i32
    return %c0_i32, %c0_i32_0 : i32, i32
  }
  func.func @transform_8(%arg0: i32) -> (i32, i32) {
    %c0_i32 = arith.constant 0 : i32
    %c0_i32_0 = arith.constant 0 : i32
    %c0_i32_1 = arith.constant 0 : i32
    return %c0_i32, %c0_i32_0 : i32, i32
  }
  func.func @transform_9(%arg0: i32) -> (i32, i32) {
    %c0_i32 = arith.constant 0 : i32
    %c0_i32_0 = arith.constant 0 : i32
    %c0_i32_1 = arith.constant 0 : i32
    return %c0_i32, %c0_i32_0 : i32, i32
  }
  func.func @transform_10(%arg0: i32) -> (i32, i32) {
    %c0_i32 = arith.constant 0 : i32
    %c0_i32_0 = arith.constant 0 : i32
    %c0_i32_1 = arith.constant 0 : i32
    return %c0_i32, %c0_i32_0 : i32, i32
  }
  func.func @transform_11(%arg0: i32) -> (i32, i32) {
    %c0_i32 = arith.constant 0 : i32
    %c0_i32_0 = arith.constant 0 : i32
    %c0_i32_1 = arith.constant 0 : i32
    return %c0_i32, %c0_i32_0 : i32, i32
  }
  func.func @transform_12(%arg0: i32) -> (i32, i32) {
    %c0_i32 = arith.constant 0 : i32
    %c0_i32_0 = arith.constant 0 : i32
    %c0_i32_1 = arith.constant 0 : i32
    return %c0_i32, %c0_i32_0 : i32, i32
  }
  func.func @transform_13(%arg0: i32) -> (i32, i32) {
    %c0_i32 = arith.constant 0 : i32
    %c0_i32_0 = arith.constant 0 : i32
    %c0_i32_1 = arith.constant 0 : i32
    return %c0_i32, %c0_i32_0 : i32, i32
  }
  func.func @transform_14(%arg0: i32) -> (i32, i32) {
    %c0_i32 = arith.constant 0 : i32
    %c0_i32_0 = arith.constant 0 : i32
    %c0_i32_1 = arith.constant 0 : i32
    return %c0_i32, %c0_i32_0 : i32, i32
  }
  func.func @transform_15(%arg0: i32) -> (i32, i32) {
    %c0_i32 = arith.constant 0 : i32
    %c0_i32_0 = arith.constant 0 : i32
    %c0_i32_1 = arith.constant 0 : i32
    return %c0_i32, %c0_i32_0 : i32, i32
  }
  func.func @transform_16(%arg0: i32) -> (i32, i32) {
    %c0_i32 = arith.constant 0 : i32
    %c0_i32_0 = arith.constant 0 : i32
    %c0_i32_1 = arith.constant 0 : i32
    return %c0_i32, %c0_i32_0 : i32, i32
  }
  func.func @transform_17(%arg0: i32) -> (i32, i32) {
    %c0_i32 = arith.constant 0 : i32
    %c0_i32_0 = arith.constant 0 : i32
    %c0_i32_1 = arith.constant 0 : i32
    return %c0_i32, %c0_i32_0 : i32, i32
  }
  func.func @transform_18(%arg0: i32) -> (i32, i32) {
    %c0_i32 = arith.constant 0 : i32
    %c0_i32_0 = arith.constant 0 : i32
    %c0_i32_1 = arith.constant 0 : i32
    return %c0_i32, %c0_i32_0 : i32, i32
  }
  func.func @transform_19(%arg0: i32) -> (i32, i32) {
    %c0_i32 = arith.constant 0 : i32
    %c0_i32_0 = arith.constant 0 : i32
    %c0_i32_1 = arith.constant 0 : i32
    return %c0_i32, %c0_i32_0 : i32, i32
  }
}

</mosaic_0001>

<bundles_post_ra>
// kernel: cnn_forward.4
= control target key start
LH: loop header
LB: loop body
LE: loop exit
PB: predicated region body
PF: predicated region fallthrough
CT: control target
= control target key end

     0   :  { %vm126_vm0 = vcmask 1044480   ;;  %vm127_vm1 = vcmask 1045504   ;;  %vm101_vm2 = vcmask 220160   ;;  %v509_v1 = vmov 65535   ;;  %s800_s1 = inlined_call_operand.vmem [shape: bf16[27,32], index: 1, kind: input, shape index: {}]   ;;  %s801_s0 = inlined_call_operand.vmem [shape: bf16[128,27], index: 0, kind: input, shape index: {}]   ;;  %s802_s2 = inlined_call_operand.vmem [shape: f32[1,32], index: 2, kind: input, shape index: {}]   ;;  %s803_s3 = inlined_call_operand.vmem [shape: f32[1,32], index: 3, kind: input, shape index: {}]   ;;  %s804_s4 = inlined_call_operand.vmem [shape: f32[1,32], index: 4, kind: input, shape index: {}]   ;;  %s805_s5 = inlined_call_operand.vmem [shape: f32[128,32], index: 5, kind: output, shape index: {}]  }
   0x1   :  { %v497_v0 = vld [vmem:[%s800_s1] sm:$0xff]   ;;  %v128_v2 = vsel %vm126_vm0, 4294967295, %v509_v1  ;;  %v498_v3 = vld [vmem:[%s800_s1 + $0x8] sm:$0x3f]   ;;  %v501_v8 = vld [vmem:[%s801_s0 + $0x10] sm:$0xff]   ;;  %vm246_vm3 = vcmask 261120  }
   0x2   :  { %472 = vmatprep.subr.bf16.mxu0 %v497_v0  ;;  %v129_v4 = vsel %vm127_vm1, %v128_v2, 0  ;;  %v499_v5 = vld [vmem:[%s801_s0] sm:$0xff]   ;;  %492 = vmatprep.subr.bf16.mxu1 %v497_v0  ;;  %v500_v7 = vld [vmem:[%s801_s0 + $0x8] sm:$0xff]   ;;  %v505_v11 = vld [vmem:[%s801_s0 + $0x30] sm:$0xff]  }
   0x3   :  { %473 = vmatpush3.bf16.msra.mxu0 %v497_v0  ;;  %v131_v6 = vand.u32 %v498_v3, %v129_v4  ;;  %494 = vmatpush3.bf16.msra.mxu1 %v497_v0  ;;  %v503_v9 = vld [vmem:[%s801_s0 + $0x20] sm:$0xff]   ;;  %v504_v10 = vld [vmem:[%s801_s0 + $0x28] sm:$0xff]   ;;  %v502_v12 = vld [vmem:[%s801_s0 + $0x18] sm:$0xff]  }
   0x4   :  { %476 = vmatprep.mubr.msk.bf16.mxu0 %vm101_vm2, %v499_v5  ;;  %484 = vmatprep.mubr.msk.bf16.mxu1 %vm101_vm2, %v503_v9  ;;  %v506_v13 = vld [vmem:[%s801_s0 + $0x38] sm:$0xff]   ;;  %v581_v14 = vld [vmem:[%s802_s2] ss:$0 sm:$0xff] }
   0x5   :  { %474 = vmatprep.subr.bf16.mxu0 %v131_v6  ;;  %493 = vmatprep.subr.bf16.mxu1 %v131_v6 }
   0x7   :  { %475 = vmatpush3.bf16.msra.mxu0 %v131_v6  ;;  %495 = vmatpush3.bf16.msra.mxu1 %v131_v6 }
   0xa   :  { %477 = vmatmul.mubr.msk.bf16.vlgmr.msra.gmra.mrb[0].mxu0 %vm101_vm2, %v500_v7  ;;  %485 = vmatmul.mubr.msk.bf16.vlgmr.msra.gmra.mrb[0].mxu1 %vm101_vm2, %v504_v10 }
   0xb   :  { %480 = vmatprep.mubr.msk.bf16.mxu0 %vm101_vm2, %v501_v8  ;;  %488 = vmatprep.mubr.msk.bf16.mxu1 %vm101_vm2, %v505_v11 }
  0x12   :  { %481 = vmatmul.mubr.msk.bf16.gmra.mrb[4].mxu0 %vm101_vm2, %v502_v12  ;;  %489 = vmatmul.mubr.msk.bf16.gmra.mrb[4].mxu1 %vm101_vm2, %v506_v13 }
  0xdd   :  { %v478_v15 = vpop.f32.mrb[0].mxu0  ;;  %v486_v16 = vpop.f32.mrb[0].mxu1 }
  0xde   :  { %v176_v17 = vadd.f32 %v478_v15, %v581_v14  ;;  %v167_v18 = vpop.f32.mrb[1].mxu0  ;;  %v199_v19 = vpop.f32.mrb[1].mxu1  ;;  %v208_v9 = vadd.f32 %v486_v16, %v581_v14 }
  0xdf   :  { %v168_v20 = vadd.f32 %v581_v14, %v167_v18  ;;  %v479_v21 = vpop.f32.mrb[2].mxu0  ;;  %v487_v22 = vpop.f32.mrb[2].mxu1  ;;  %v200_v32 = vadd.f32 %v581_v14, %v199_v19 }
  0xe0   :  { %v179_v23 = vadd.f32 %v479_v21, %v581_v14  ;;  %v170_v24 = vpop.f32.mrb[3].mxu0  ;;  %v202_v25 = vpop.f32.mrb[3].mxu1  ;;  %v586_v26 = vmax.f32 %v176_v17, 0.0  ;;  %v211_v19 = vadd.f32 %v487_v22, %v581_v14 }
  0xe1   :  { %v588_v27 = vmax.f32 %v168_v20, 0.0  ;;  %v171_v28 = vadd.f32 %v581_v14, %v170_v24  ;;  %v617_v54 = vmax.f32 %v200_v32, 0.0  ;;  %v203_v6 = vadd.f32 %v581_v14, %v202_v25 }
  0xe2   :  { %v591_v29 = vmax.f32 %v179_v23, 0.0  ;;  %v288_v33 = vmul.f32 %v586_v26, %v586_v26  ;;  %v250_v44 = vsel %vm246_vm3, %v586_v26, 0.0  ;;  %v661_v32 = vmax.f32 %v208_v9, 0.0 }
  0xe3   :  { %v286_v30 = vmul.f32 %v588_v27, %v588_v27  ;;  %v595_v31 = vmax.f32 %v171_v28, 0.0  ;;  %v247_v34 = vsel %vm246_vm3, %v588_v27, 0.0  ;;  %v294_v18 = vmul.f32 %v617_v54, %v617_v54 }
  0xe4   :  { %v289_v39 = vmul.f32 %v591_v29, %v591_v29  ;;  %v305_v56 = vsel %vm246_vm3, %v288_v33, 0.0  ;;  %v252_v57 = vsel %vm246_vm3, %v591_v29, 0.0  ;;  %v653_v21 = vmax.f32 %v203_v6, 0.0 }
  0xe5   :  { %v248_v35 = vsel %vm246_vm3, %v595_v31, 0.0  ;;  %v287_v36 = vmul.f32 %v595_v31, %v595_v31  ;;  %v482_v37 = vpop.f32.mrb[4].mxu0  ;;  %v606_v38 = vpop.f32.mrb[4].mxu1  ;;  %v302_v45 = vsel %vm246_vm3, %v286_v30, 0.0  ;;  %v262_v28 = vsel %vm246_vm3, %v617_v54, 0.0 }
  0xe6   :  { %v249_v40 = vadd.f32 %v248_v35, %v247_v34  ;;  %v192_v41 = vadd.f32 %v482_v37, %v581_v14  ;;  %v183_v42 = vpop.f32.mrb[5].mxu0  ;;  %v215_v43 = vpop.f32.mrb[5].mxu1  ;;  %v307_v60 = vsel %vm246_vm3, %v289_v39, 0.0  ;;  %v317_v35 = vsel %vm246_vm3, %v294_v18, 0.0 }
  0xe7   :  { %v303_v46 = vsel %vm246_vm3, %v287_v36, 0.0  ;;  %v184_v47 = vadd.f32 %v581_v14, %v183_v42  ;;  %v483_v48 = vpop.f32.mrb[6].mxu0  ;;  %v491_v49 = vpop.f32.mrb[6].mxu1  ;;  %v216_v23 = vadd.f32 %v581_v14, %v215_v43  ;;  %v665_v36 = vmax.f32 %v211_v19, 0.0 }
  0xe8   :  { %v251_v50 = vadd.f32 %v250_v44, %v249_v40  ;;  %v304_v51 = vadd.f32 %v303_v46, %v302_v45  ;;  %v195_v52 = vadd.f32 %v483_v48, %v581_v14  ;;  %v186_v53 = vpop.f32.mrb[7].mxu0  ;;  %v218_v55 = vpop.f32.mrb[7].mxu1  ;;  %v626_v62 = vmax.f32 %v192_v41, 0.0 }
  0xe9   :  { %v622_v58 = vmax.f32 %v184_v47, 0.0  ;;  %v187_v59 = vadd.f32 %v581_v14, %v186_v53  ;;  %v295_v39 = vmul.f32 %v653_v21, %v653_v21  ;;  %v669_v40 = vmax.f32 %v216_v23, 0.0 }
  0xea   :  { %v306_v61 = vadd.f32 %v305_v56, %v304_v51  ;;  %v253_v63 = vadd.f32 %v252_v57, %v251_v50  ;;  %v632_v2 = vmax.f32 %v195_v52, 0.0  ;;  %v292_v10 = vmul.f32 %v626_v62, %v626_v62 }
  0xeb   :  { %v254_v0 = vsel %vm246_vm3, %v622_v58, 0.0  ;;  %v290_v1 = vmul.f32 %v622_v58, %v622_v58  ;;  %v634_v3 = vmax.f32 %v187_v59, 0.0  ;;  %v258_v15 = vsel %vm246_vm3, %v626_v62, 0.0 }
  0xec   :  { %v255_v4 = vadd.f32 %v254_v0, %v253_v63  ;;  %v308_v5 = vadd.f32 %v307_v60, %v306_v61  ;;  %v293_v17 = vmul.f32 %v632_v2, %v632_v2  ;;  %v260_v24 = vsel %vm246_vm3, %v632_v2, 0.0 }
  0xed   :  { %v309_v7 = vsel %vm246_vm3, %v290_v1, 0.0  ;;  %v256_v8 = vsel %vm246_vm3, %v634_v3, 0.0  ;;  %v291_v13 = vmul.f32 %v634_v3, %v634_v3  ;;  %v313_v30 = vsel %vm246_vm3, %v292_v10, 0.0 }
  0xee   :  { %v310_v11 = vadd.f32 %v309_v7, %v308_v5  ;;  %v257_v12 = vadd.f32 %v256_v8, %v255_v4  ;;  %v315_v22 = vsel %vm246_vm3, %v293_v17, 0.0  ;;  %v219_v41 = vadd.f32 %v581_v14, %v218_v55 }
  0xef   :  { %v311_v20 = vsel %vm246_vm3, %v291_v13, 0.0  ;;  %v264_v43 = vsel %vm246_vm3, %v653_v21, 0.0  ;;  %v296_v44 = vmul.f32 %v661_v32, %v661_v32  ;;  %v224_v46 = vadd.f32 %v606_v38, %v581_v14 }
  0xf0   :  { %v259_v16 = vadd.f32 %v258_v15, %v257_v12  ;;  %v312_v25 = vadd.f32 %v311_v20, %v310_v11  ;;  %v266_v47 = vsel %vm246_vm3, %v661_v32, 0.0  ;;  %v297_v50 = vmul.f32 %v665_v36, %v665_v36 }
  0xf1   :  { %v227_v51 = vadd.f32 %v491_v49, %v581_v14  ;;  %v319_v53 = vsel %vm246_vm3, %v295_v39, 0.0  ;;  %v298_v55 = vmul.f32 %v669_v40, %v669_v40  ;;  %v686_v56 = vmax.f32 %v219_v41, 0.0 }
  0xf2   :  { %v261_v33 = vadd.f32 %v260_v24, %v259_v16  ;;  %v314_v34 = vadd.f32 %v313_v30, %v312_v25  ;;  %v268_v38 = vsel %vm246_vm3, %v665_v36, 0.0  ;;  %v270_v59 = vsel %vm246_vm3, %v669_v40, 0.0 }
  0xf3   :  { %v321_v60 = vsel %vm246_vm3, %v296_v44, 0.0  ;;  %v693_v61 = vmax.f32 %v224_v46, 0.0  ;;  %v323_v49 = vsel %vm246_vm3, %v297_v50, 0.0  ;;  %v325_v1 = vsel %vm246_vm3, %v298_v55, 0.0 }
  0xf4   :  { %v263_v37 = vadd.f32 %v262_v28, %v261_v33  ;;  %v316_v42 = vadd.f32 %v315_v22, %v314_v34  ;;  %v697_v4 = vmax.f32 %v227_v51, 0.0  ;;  %v299_v5 = vmul.f32 %v686_v56, %v686_v56 }
  0xf5   :  { %v272_v7 = vsel %vm246_vm3, %v686_v56, 0.0  ;;  %v300_v8 = vmul.f32 %v693_v61, %v693_v61  ;;  %v274_v10 = vsel %vm246_vm3, %v693_v61, 0.0 }
  0xf6   :  { %v265_v45 = vadd.f32 %v264_v43, %v263_v37  ;;  %v318_v48 = vadd.f32 %v317_v35, %v316_v42  ;;  %v301_v12 = vmul.f32 %v697_v4, %v697_v4  ;;  %v327_v15 = vsel %vm246_vm3, %v299_v5, 0.0 }
  0xf7   :  { %v276_v17 = vsel %vm246_vm3, %v697_v4, 0.0  ;;  %v329_v19 = vsel %vm246_vm3, %v300_v8, 0.0 }
  0xf8   :  { %v267_v52 = vadd.f32 %v266_v47, %v265_v45  ;;  %v320_v57 = vadd.f32 %v319_v53, %v318_v48  ;;  %v331_v23 = vsel %vm246_vm3, %v301_v12, 0.0 }
  0xfa   :  { %v269_v14 = vadd.f32 %v268_v38, %v267_v52  ;;  %v322_v63 = vadd.f32 %v321_v60, %v320_v57 }
  0xfc   :  { %v271_v0 = vadd.f32 %v270_v59, %v269_v14  ;;  %v324_v6 = vadd.f32 %v323_v49, %v322_v63 }
  0xfe   :  { %v273_v9 = vadd.f32 %v272_v7, %v271_v0  ;;  %v326_v11 = vadd.f32 %v325_v1, %v324_v6 }
 0x100   :  { %v275_v13 = vadd.f32 %v274_v10, %v273_v9  ;;  %v328_v18 = vadd.f32 %v327_v15, %v326_v11  ;;  %v461_v15 = vld [vmem:[%s804_s4] ss:$0 sm:$0xff] }
 0x102   :  { %v277_v16 = vadd.f32 %v276_v17, %v275_v13  ;;  %v330_v20 = vadd.f32 %v329_v19, %v328_v18 }
 0x104   :  { %v278_v24 = vrot.slane %v277_v16, 4  ;;  %v332_v25 = vadd.f32 %v331_v23, %v330_v20 }
 0x106   :  { %v279_v28 = vadd.f32 %v278_v24, %v277_v16  ;;  %v333_v30 = vrot.slane %v332_v25, 4 }
 0x108   :  { %v280_v33 = vrot.slane %v279_v28, 2  ;;  %v334_v22 = vadd.f32 %v333_v30, %v332_v25 }
 0x10a   :  { %v281_v34 = vadd.f32 %v280_v33, %v279_v28  ;;  %v335_v35 = vrot.slane %v334_v22, 2 }
 0x10c   :  { %v282_v37 = vrot.slane %v281_v34, 1  ;;  %v336_v39 = vadd.f32 %v335_v35, %v334_v22 }
 0x10e   :  { %v283_v41 = vadd.f32 %v282_v37, %v281_v34  ;;  %v337_v42 = vrot.slane %v336_v39, 1 }
 0x110   :  { %v285_v43 = vmul.f32 0.0078125, %v283_v41  ;;  %v338_v44 = vadd.f32 %v337_v42, %v336_v39 }
 0x112   :  { %v340_v45 = vmul.f32 %v285_v43, %v285_v43  ;;  %v345_v46 = vsub.f32 %v588_v27, %v285_v43  ;;  %v346_v47 = vsub.f32 %v595_v31, %v285_v43  ;;  %v347_v48 = vsub.f32 %v586_v26, %v285_v43 }
 0x113   :  { %v339_v50 = vmul.f32 0.0078125, %v338_v44  ;;  %v348_v51 = vsub.f32 %v591_v29, %v285_v43  ;;  %v349_v52 = vsub.f32 %v622_v58, %v285_v43  ;;  %v350_v53 = vsub.f32 %v634_v3, %v285_v43 }
 0x114   :  { %v351_v55 = vsub.f32 %v626_v62, %v285_v43  ;;  %v352_v38 = vsub.f32 %v632_v2, %v285_v43  ;;  %v353_v57 = vsub.f32 %v617_v54, %v285_v43  ;;  %v354_v59 = vsub.f32 %v653_v21, %v285_v43 }
 0x115   :  { %v341_v27 = vsub.f32 %v339_v50, %v340_v45  ;;  %v355_v31 = vsub.f32 %v661_v32, %v285_v43  ;;  %v356_v26 = vsub.f32 %v665_v36, %v285_v43  ;;  %v357_v60 = vsub.f32 %v669_v40, %v285_v43  ;;  %v460_v32 = vld [vmem:[%s803_s3] ss:$0 sm:$0xff] }
 0x116   :  { %v358_v29 = vsub.f32 %v686_v56, %v285_v43  ;;  %v359_v58 = vsub.f32 %v693_v61, %v285_v43  ;;  %v360_v3 = vsub.f32 %v697_v4, %v285_v43 }
 0x117   :  { %v342_v62 = vmax.f32 %v341_v27, 0.0 }
 0x119   :  { %v343_v14 = vadd.f32 1e-05, %v342_v62 }
 0x11b   :  { %507 = vrsqrt.f32 %v343_v14 }
 0x125   :  { %v508_v2 = vpop.eup %507 }
 0x126   :  { %v361_v54 = vmul.f32 %v508_v2, %v345_v46  ;;  %v362_v49 = vmul.f32 %v508_v2, %v346_v47  ;;  %v363_v21 = vmul.f32 %v508_v2, %v347_v48  ;;  %v364_v63 = vmul.f32 %v508_v2, %v348_v51 }
 0x127   :  { %v365_v36 = vmul.f32 %v508_v2, %v349_v52  ;;  %v366_v40 = vmul.f32 %v508_v2, %v350_v53  ;;  %v367_v0 = vmul.f32 %v508_v2, %v351_v55  ;;  %v368_v56 = vmul.f32 %v508_v2, %v352_v38 }
 0x128   :  { %v369_v1 = vmul.f32 %v508_v2, %v353_v57  ;;  %v370_v61 = vmul.f32 %v508_v2, %v354_v59  ;;  %v371_v5 = vmul.f32 %v508_v2, %v355_v31  ;;  %v372_v4 = vmul.f32 %v508_v2, %v356_v26 }
 0x129   :  { %v373_v6 = vmul.f32 %v508_v2, %v357_v60  ;;  %v374_v7 = vmul.f32 %v508_v2, %v358_v29  ;;  %v375_v8 = vmul.f32 %v508_v2, %v359_v58  ;;  %v376_v9 = vmul.f32 %v508_v2, %v360_v3 }
 0x12a   :  { %v383_v10 = vmul.f32 %v460_v32, %v361_v54  ;;  %v384_v11 = vmul.f32 %v460_v32, %v362_v49  ;;  %v385_v12 = vmul.f32 %v460_v32, %v363_v21  ;;  %v386_v13 = vmul.f32 %v460_v32, %v364_v63 }
 0x12b   :  { %v387_v17 = vmul.f32 %v460_v32, %v365_v36  ;;  %v388_v18 = vmul.f32 %v460_v32, %v366_v40  ;;  %v389_v19 = vmul.f32 %v460_v32, %v367_v0  ;;  %v390_v16 = vmul.f32 %v460_v32, %v368_v56 }
 0x12c   :  { %v391_v20 = vmul.f32 %v460_v32, %v369_v1  ;;  %v392_v23 = vmul.f32 %v460_v32, %v370_v61  ;;  %v393_v24 = vmul.f32 %v460_v32, %v371_v5  ;;  %v394_v25 = vmul.f32 %v460_v32, %v372_v4 }
 0x12d   :  { %v395_v28 = vmul.f32 %v460_v32, %v373_v6  ;;  %v396_v30 = vmul.f32 %v460_v32, %v374_v7  ;;  %v397_v33 = vmul.f32 %v460_v32, %v375_v8  ;;  %v398_v22 = vmul.f32 %v460_v32, %v376_v9 }
 0x12e   :  { %v405_v34 = vadd.f32 %v461_v15, %v383_v10  ;;  %v406_v35 = vadd.f32 %v461_v15, %v384_v11  ;;  %v407_v37 = vadd.f32 %v461_v15, %v385_v12  ;;  %v408_v39 = vadd.f32 %v461_v15, %v386_v13 }
 0x12f   :  { %v409_v41 = vadd.f32 %v461_v15, %v387_v17  ;;  %v410_v42 = vadd.f32 %v461_v15, %v388_v18  ;;  %v411_v43 = vadd.f32 %v461_v15, %v389_v19  ;;  %v412_v44 = vadd.f32 %v461_v15, %v390_v16 }
 0x130   :  { %v413_v45 = vadd.f32 %v461_v15, %v391_v20  ;;  %v414_v46 = vadd.f32 %v461_v15, %v392_v23  ;;  %v415_v47 = vadd.f32 %v461_v15, %v393_v24  ;;  %v416_v48 = vadd.f32 %v461_v15, %v394_v25  ;;  %421 = vst.msk [vmem:[%s805_s5] sm:$0xff] %vm246_vm3, %v405_v34 }
 0x131   :  { %422 = vst.msk [vmem:[%s805_s5 + $0x8] sm:$0xff] %vm246_vm3, %v406_v35  ;;  %423 = vst.msk [vmem:[%s805_s5 + $0x10] sm:$0xff] %vm246_vm3, %v407_v37  ;;  %v417_v50 = vadd.f32 %v461_v15, %v395_v28  ;;  %v418_v51 = vadd.f32 %v461_v15, %v396_v30  ;;  %v419_v52 = vadd.f32 %v461_v15, %v397_v33 }
 0x132   :  { %424 = vst.msk [vmem:[%s805_s5 + $0x18] sm:$0xff] %vm246_vm3, %v408_v39  ;;  %v420_v53 = vadd.f32 %v461_v15, %v398_v22  ;;  %425 = vst.msk [vmem:[%s805_s5 + $0x20] sm:$0xff] %vm246_vm3, %v409_v41 }
 0x133   :  { %426 = vst.msk [vmem:[%s805_s5 + $0x28] sm:$0xff] %vm246_vm3, %v410_v42  ;;  %427 = vst.msk [vmem:[%s805_s5 + $0x30] sm:$0xff] %vm246_vm3, %v411_v43 }
 0x134   :  { %428 = vst.msk [vmem:[%s805_s5 + $0x38] sm:$0xff] %vm246_vm3, %v412_v44  ;;  %429 = vst.msk [vmem:[%s805_s5 + $0x40] sm:$0xff] %vm246_vm3, %v413_v45 }
 0x135   :  { %430 = vst.msk [vmem:[%s805_s5 + $0x48] sm:$0xff] %vm246_vm3, %v414_v46  ;;  %431 = vst.msk [vmem:[%s805_s5 + $0x50] sm:$0xff] %vm246_vm3, %v415_v47 }
 0x136   :  { %432 = vst.msk [vmem:[%s805_s5 + $0x58] sm:$0xff] %vm246_vm3, %v416_v48  ;;  %433 = vst.msk [vmem:[%s805_s5 + $0x60] sm:$0xff] %vm246_vm3, %v417_v50 }
 0x137   :  { %434 = vst.msk [vmem:[%s805_s5 + $0x68] sm:$0xff] %vm246_vm3, %v418_v51  ;;  %435 = vst.msk [vmem:[%s805_s5 + $0x70] sm:$0xff] %vm246_vm3, %v419_v52 }
 0x138   :  { %436 = vst.msk [vmem:[%s805_s5 + $0x78] sm:$0xff] %vm246_vm3, %v420_v53 }

// kernel: cnn_forward.5
= control target key start
LH: loop header
LB: loop body
LE: loop exit
PB: predicated region body
PF: predicated region fallthrough
CT: control target
= control target key end

     0   :  { %vm212_vm0 = vcmask 261120   ;;  %vm321_vm1 = vcmask 523264   ;;  %s628_s1 = inlined_call_operand.vmem [shape: bf16[288,64], index: 1, kind: input, shape index: {}]   ;;  %s629_s0 = inlined_call_operand.vmem [shape: bf16[32,288], index: 0, kind: input, shape index: {}]   ;;  %s630_s2 = inlined_call_operand.vmem [shape: f32[1,64], index: 2, kind: input, shape index: {}]   ;;  %s631_s3 = inlined_call_operand.vmem [shape: f32[1,64], index: 3, kind: input, shape index: {}]   ;;  %s632_s4 = inlined_call_operand.vmem [shape: f32[1,64], index: 4, kind: input, shape index: {}]   ;;  %s633_s5 = inlined_call_operand.vmem [shape: f32[32,64], index: 5, kind: output, shape index: {}]  }
   0x1   :  { %v465_v0 = vld [vmem:[%s628_s1 + $0x40] sm:$0xff]   ;;  %v467_v2 = vld [vmem:[%s628_s1 + $0x48] sm:$0xff]   ;;  %v469_v4 = vld [vmem:[%s628_s1 + $0x50] sm:$0xff]  }
   0x2   :  { %v466_v1 = vld [vmem:[%s628_s1] sm:$0xff]   ;;  %425 = vmatprep.subr.bf16.mxu0 %v465_v0  ;;  %v468_v3 = vld [vmem:[%s628_s1 + $0x8] sm:$0xff]   ;;  %v470_v5 = vld [vmem:[%s628_s1 + $0x10] sm:$0xff]  }
   0x3   :  { %426 = vmatpush3.bf16.msra.mxu0 %v466_v1  ;;  %v471_v6 = vld [vmem:[%s628_s1 + $0x58] sm:$0xff]   ;;  %v473_v8 = vld [vmem:[%s628_s1 + $0x60] sm:$0xff]   ;;  %v475_v11 = vld [vmem:[%s628_s1 + $0x68] sm:$0xff]  }
   0x4   :  { %427 = vmatprep.subr.bf16.mxu0 %v467_v2  ;;  %v472_v7 = vld [vmem:[%s628_s1 + $0x18] sm:$0xff]   ;;  %v474_v9 = vld [vmem:[%s628_s1 + $0x20] sm:$0xff]   ;;  %v476_v12 = vld [vmem:[%s628_s1 + $0x28] sm:$0xff]  }
   0x5   :  { %v480_v10 = vld [vmem:[%s628_s1 + $0x80] sm:$0xff]   ;;  %v477_v13 = vld [vmem:[%s628_s1 + $0x70] sm:$0xff]   ;;  %v485_v15 = vld [vmem:[%s628_s1 + $0x88] sm:$0xff]  }
   0x6   :  { %457 = vmatprep.subr.bf16.mxu1 %v480_v10  ;;  %v484_v14 = vld [vmem:[%s629_s0 + $0x4] ss:$12 sps:$4 sm:$0xff]   ;;  %v486_v16 = vld [vmem:[%s629_s0 + $0x8] ss:$12 sps:$4 sm:$0xff]   ;;  %v487_v17 = vld [vmem:[%s629_s0 + $0x20] ss:$12 sps:$4 sm:$0xff]  }
   0x7   :  { %428 = vmatpush3.bf16.msra.mxu0 %v468_v3  ;;  %458 = vmatpush3.bf16.msra.mxu1 %v480_v10  ;;  %v478_v18 = vld [vmem:[%s628_s1 + $0x30] sm:$0xff]   ;;  %v479_v19 = vld [vmem:[%s628_s1 + $0x78] sm:$0xff]   ;;  %v482_v21 = vld [vmem:[%s629_s0] ss:$12 sps:$4 sm:$0xff]  }
   0x8   :  { %429 = vmatprep.subr.bf16.mxu0 %v469_v4  ;;  %251 = vmatprep.mubr.bf16.mxu0 %v484_v14  ;;  %v481_v20 = vld [vmem:[%s628_s1 + $0x38] sm:$0xff]   ;;  %v396_v30 = vld [vmem:[%s630_s2] ss:$0 sm:$0xff] }
   0x9   :  { %459 = vmatprep.subr.bf16.mxu1 %v485_v15  ;;  %461 = vmatprep.mubr.msk.bf16.mxu1 %vm212_vm0, %v486_v16  ;;  %v488_v22 = vld [vmem:[%s629_s0 + $0x1c] ss:$12 sps:$4 sm:$0xff]   ;;  %v490_v23 = vld [vmem:[%s629_s0 + $0x18] ss:$12 sps:$4 sm:$0xff]  }
   0xb   :  { %430 = vmatpush3.bf16.msra.mxu0 %v470_v5  ;;  %460 = vmatpush3.bf16.msra.mxu1 %v485_v15 }
   0xc   :  { %431 = vmatprep.subr.bf16.mxu0 %v471_v6 }
   0xe   :  { %462 = vmatmul.mubr.msk.bf16.vlgmr.msra.gmra.mrb[0].mxu1 %vm212_vm0, %v487_v17 }
   0xf   :  { %432 = vmatpush3.bf16.msra.mxu0 %v472_v7 }
  0x10   :  { %433 = vmatprep.subr.bf16.mxu0 %v473_v8 }
  0x13   :  { %434 = vmatpush3.bf16.msra.mxu0 %v474_v9 }
  0x14   :  { %435 = vmatprep.subr.bf16.mxu0 %v475_v11 }
  0x17   :  { %436 = vmatpush3.bf16.msra.mxu0 %v476_v12 }
  0x18   :  { %437 = vmatprep.subr.bf16.mxu0 %v477_v13 }
  0x1b   :  { %438 = vmatpush3.bf16.msra.mxu0 %v478_v18 }
  0x1c   :  { %439 = vmatprep.subr.bf16.mxu0 %v479_v19 }
  0x1f   :  { %440 = vmatpush3.bf16.msra.mxu0 %v481_v20 }
  0x22   :  { %252 = vmatmul.mubr.bf16.vlgmr.msra.gmra.mrb[0].mxu0 %v482_v21 }
  0x23   :  { %259 = vmatprep.mubr.bf16.mxu0 %v488_v22 }
  0x2a   :  { %260 = vmatmul.mubr.bf16.gmra.mrb[4].mxu0 %v490_v23 }
  0xe1   :  { %v463_v24 = vpop.f32.mrb[0].mxu1 }
  0xe2   :  { %v302_v25 = vpop.f32.mrb[1].mxu1 }
  0xe3   :  { %v464_v26 = vpop.f32.mrb[2].mxu1 }
  0xe4   :  { %v305_v27 = vpop.f32.mrb[3].mxu1 }
  0xf5   :  { %v441_v28 = vpop.f32.mrb[0].mxu0 }
  0xf6   :  { %v442_v29 = vpop.f32.mrb[1].mxu0 }
  0xf7   :  { %v443_v31 = vadd.f32 %v442_v29, %v441_v28  ;;  %v444_v32 = vpop.f32.mrb[2].mxu0 }
  0xf8   :  { %v445_v33 = vpop.f32.mrb[3].mxu0 }
  0xf9   :  { %v446_v34 = vadd.f32 %v445_v33, %v444_v32  ;;  %v254_v35 = vadd.f32 %v443_v31, %v396_v30 }
  0xfb   :  { %v303_v36 = vadd.f32 %v302_v25, %v254_v35  ;;  %v257_v37 = vadd.f32 %v446_v34, %v396_v30  ;;  %v424_v35 = vld [vmem:[%s632_s4] ss:$0 sm:$0xff] }
  0xfd   :  { %v317_v38 = vmax.f32 %v303_v36, 0.0  ;;  %v306_v39 = vadd.f32 %v305_v27, %v257_v37  ;;  %v447_v40 = vpop.f32.mrb[4].mxu0 }
  0xfe   :  { %v448_v41 = vpop.f32.mrb[5].mxu0 }
  0xff   :  { %v337_v42 = vmul.f32 %v317_v38, %v317_v38  ;;  %v318_v43 = vmax.f32 %v306_v39, 0.0  ;;  %v449_v44 = vadd.f32 %v448_v41, %v447_v40  ;;  %v450_v45 = vpop.f32.mrb[6].mxu0  ;;  %v322_v47 = vsel %vm321_vm1, %v317_v38, 0.0 }
 0x100   :  { %v451_v46 = vpop.f32.mrb[7].mxu0 }
 0x101   :  { %v323_v48 = vsel %vm321_vm1, %v318_v43, 0.0  ;;  %v338_v49 = vmul.f32 %v318_v43, %v318_v43  ;;  %v262_v50 = vadd.f32 %v449_v44, %v396_v30  ;;  %v452_v52 = vadd.f32 %v451_v46, %v450_v45 }
 0x102   :  { %v324_v51 = vadd.f32 %v323_v48, %v322_v47  ;;  %v341_v53 = vsel %vm321_vm1, %v337_v42, 0.0 }
 0x103   :  { %v342_v54 = vsel %vm321_vm1, %v338_v49, 0.0  ;;  %v311_v55 = vadd.f32 %v463_v24, %v262_v50  ;;  %v265_v57 = vadd.f32 %v452_v52, %v396_v30  ;;  %v423_v30 = vld [vmem:[%s631_s3] ss:$0 sm:$0xff] }
 0x104   :  { %v343_v56 = vadd.f32 %v342_v54, %v341_v53 }
 0x105   :  { %v319_v58 = vmax.f32 %v311_v55, 0.0  ;;  %v314_v59 = vadd.f32 %v464_v26, %v265_v57 }
 0x107   :  { %v325_v60 = vsel %vm321_vm1, %v319_v58, 0.0  ;;  %v339_v61 = vmul.f32 %v319_v58, %v319_v58  ;;  %v320_v63 = vmax.f32 %v314_v59, 0.0 }
 0x108   :  { %v326_v62 = vadd.f32 %v325_v60, %v324_v51 }
 0x109   :  { %v344_v0 = vsel %vm321_vm1, %v339_v61, 0.0  ;;  %v327_v2 = vsel %vm321_vm1, %v320_v63, 0.0  ;;  %v340_v3 = vmul.f32 %v320_v63, %v320_v63 }
 0x10a   :  { %v345_v1 = vadd.f32 %v344_v0, %v343_v56  ;;  %v328_v4 = vadd.f32 %v327_v2, %v326_v62 }
 0x10b   :  { %v346_v5 = vsel %vm321_vm1, %v340_v3, 0.0 }
 0x10c   :  { %v329_v6 = vrot.slane %v328_v4, 4  ;;  %v347_v7 = vadd.f32 %v346_v5, %v345_v1 }
 0x10e   :  { %v330_v8 = vadd.f32 %v329_v6, %v328_v4  ;;  %v348_v9 = vrot.slane %v347_v7, 4 }
 0x110   :  { %v331_v10 = vrot.slane %v330_v8, 2  ;;  %v349_v11 = vadd.f32 %v348_v9, %v347_v7 }
 0x112   :  { %v332_v12 = vadd.f32 %v331_v10, %v330_v8  ;;  %v350_v13 = vrot.slane %v349_v11, 2 }
 0x114   :  { %v333_v14 = vrot.slane %v332_v12, 1  ;;  %v351_v15 = vadd.f32 %v350_v13, %v349_v11 }
 0x116   :  { %v334_v16 = vadd.f32 %v333_v14, %v332_v12  ;;  %v352_v17 = vrot.slane %v351_v15, 1 }
 0x118   :  { %v336_v18 = vmul.f32 0.03125, %v334_v16  ;;  %v353_v19 = vadd.f32 %v352_v17, %v351_v15 }
 0x11a   :  { %v354_v20 = vmul.f32 0.03125, %v353_v19  ;;  %v355_v21 = vmul.f32 %v336_v18, %v336_v18  ;;  %v360_v22 = vsub.f32 %v317_v38, %v336_v18  ;;  %v361_v23 = vsub.f32 %v318_v43, %v336_v18 }
 0x11b   :  { %v362_v24 = vsub.f32 %v319_v58, %v336_v18  ;;  %v363_v25 = vsub.f32 %v320_v63, %v336_v18 }
 0x11c   :  { %v356_v26 = vsub.f32 %v354_v20, %v355_v21 }
 0x11e   :  { %v357_v27 = vmax.f32 %v356_v26, 0.0 }
 0x120   :  { %v358_v28 = vadd.f32 1e-05, %v357_v27 }
 0x122   :  { %491 = vrsqrt.f32 %v358_v28 }
 0x12c   :  { %v492_v29 = vpop.eup %491 }
 0x12d   :  { %v364_v31 = vmul.f32 %v492_v29, %v360_v22  ;;  %v365_v32 = vmul.f32 %v492_v29, %v361_v23  ;;  %v366_v33 = vmul.f32 %v492_v29, %v362_v24  ;;  %v367_v34 = vmul.f32 %v492_v29, %v363_v25 }
 0x12f   :  { %v374_v36 = vmul.f32 %v423_v30, %v364_v31  ;;  %v375_v37 = vmul.f32 %v423_v30, %v365_v32  ;;  %v376_v38 = vmul.f32 %v423_v30, %v366_v33  ;;  %v377_v39 = vmul.f32 %v423_v30, %v367_v34 }
 0x131   :  { %v384_v40 = vadd.f32 %v424_v35, %v374_v36  ;;  %v385_v41 = vadd.f32 %v424_v35, %v375_v37  ;;  %v386_v42 = vadd.f32 %v424_v35, %v376_v38  ;;  %v387_v43 = vadd.f32 %v424_v35, %v377_v39 }
 0x133   :  { %388 = vst.msk [vmem:[%s633_s5] sm:$0xff] %vm321_vm1, %v384_v40  ;;  %389 = vst.msk [vmem:[%s633_s5 + $0x8] sm:$0xff] %vm321_vm1, %v385_v41 }
 0x134   :  { %390 = vst.msk [vmem:[%s633_s5 + $0x10] sm:$0xff] %vm321_vm1, %v386_v42  ;;  %391 = vst.msk [vmem:[%s633_s5 + $0x18] sm:$0xff] %vm321_vm1, %v387_v43 }

// kernel: cnn_forward.6
= control target key start
LH: loop header
LB: loop body
LE: loop exit
PB: predicated region body
PF: predicated region fallthrough
CT: control target
= control target key end

     0   :  { %v656_v35 = vmov 0.0   ;;  %vm657_vm0 = vmmov 0   ;;  %vm338_vm1 = vcmask 523264   ;;  %s817_s1 = inlined_call_operand.vmem [shape: bf16[576,128], index: 1, kind: input, shape index: {}]   ;;  %s818_s0 = inlined_call_operand.vmem [shape: bf16[8,576], index: 0, kind: input, shape index: {}]   ;;  %s819_s2 = inlined_call_operand.vmem [shape: f32[1,128], index: 2, kind: input, shape index: {}]   ;;  %s820_s3 = inlined_call_operand.vmem [shape: f32[1,128], index: 3, kind: input, shape index: {}]   ;;  %s821_s4 = inlined_call_operand.vmem [shape: f32[1,128], index: 4, kind: input, shape index: {}]   ;;  %s822_s5 = inlined_call_operand.vmem [shape: f32[8,128], index: 5, kind: output, shape index: {}]  }
   0x1   :  { %v613_v0 = vld [vmem:[%s817_s1 + $0x40] sm:$0xff]   ;;  %v617_v4 = vld [vmem:[%s817_s1 + $0x48] sm:$0xff]   ;;  %v621_v8 = vld [vmem:[%s817_s1 + $0x50] sm:$0xff]  }
   0x2   :  { %v614_v1 = vld [vmem:[%s817_s1] sm:$0xff]   ;;  %550 = vmatprep.subr.bf16.mxu0 %v613_v0  ;;  %v618_v5 = vld [vmem:[%s817_s1 + $0x8] sm:$0xff]   ;;  %v622_v9 = vld [vmem:[%s817_s1 + $0x10] sm:$0xff]  }
   0x3   :  { %v615_v2 = vld [vmem:[%s817_s1 + $0xc0] sm:$0xff]   ;;  %551 = vmatpush3.bf16.msra.mxu0 %v614_v1  ;;  %v619_v6 = vld [vmem:[%s817_s1 + $0xc8] sm:$0xff]   ;;  %v623_v10 = vld [vmem:[%s817_s1 + $0xd0] sm:$0xff]  }
   0x4   :  { %v616_v3 = vld [vmem:[%s817_s1 + $0x80] sm:$0xff]   ;;  %572 = vmatprep.subr.bf16.mxu1 %v615_v2  ;;  %552 = vmatprep.subr.bf16.mxu0 %v617_v4  ;;  %v620_v7 = vld [vmem:[%s817_s1 + $0x88] sm:$0xff]   ;;  %v624_v11 = vld [vmem:[%s817_s1 + $0x90] sm:$0xff]  }
   0x5   :  { %573 = vmatpush3.bf16.msra.mxu1 %v616_v3  ;;  %v625_v12 = vld [vmem:[%s817_s1 + $0x58] sm:$0xff]   ;;  %v629_v16 = vld [vmem:[%s817_s1 + $0x60] sm:$0xff]   ;;  %v633_v20 = vld [vmem:[%s817_s1 + $0x68] sm:$0xff]  }
   0x6   :  { %574 = vmatprep.subr.bf16.mxu1 %v619_v6  ;;  %v626_v13 = vld [vmem:[%s817_s1 + $0x18] sm:$0xff]   ;;  %v630_v17 = vld [vmem:[%s817_s1 + $0x20] sm:$0xff]   ;;  %v634_v21 = vld [vmem:[%s817_s1 + $0x28] sm:$0xff]  }
   0x7   :  { %553 = vmatpush3.bf16.msra.mxu0 %v618_v5  ;;  %v627_v14 = vld [vmem:[%s817_s1 + $0xd8] sm:$0xff]   ;;  %v631_v18 = vld [vmem:[%s817_s1 + $0xe0] sm:$0xff]   ;;  %v635_v22 = vld [vmem:[%s817_s1 + $0xe8] sm:$0xff]  }
   0x8   :  { %554 = vmatprep.subr.bf16.mxu0 %v621_v8  ;;  %v628_v15 = vld [vmem:[%s817_s1 + $0x98] sm:$0xff]   ;;  %v632_v19 = vld [vmem:[%s817_s1 + $0xa0] sm:$0xff]   ;;  %v636_v23 = vld [vmem:[%s817_s1 + $0xa8] sm:$0xff]  }
   0x9   :  { %575 = vmatpush3.bf16.msra.mxu1 %v620_v7  ;;  %v637_v24 = vld [vmem:[%s817_s1 + $0x70] sm:$0xff]   ;;  %v641_v28 = vld [vmem:[%s817_s1 + $0x78] sm:$0xff]   ;;  %v21_v31 = vld [vmem:[%s818_s0] sm:$0xff] }
   0xa   :  { %576 = vmatprep.subr.bf16.mxu1 %v623_v10  ;;  %v638_v25 = vld [vmem:[%s817_s1 + $0x30] sm:$0xff]   ;;  %v642_v29 = vld [vmem:[%s817_s1 + $0x38] sm:$0xff]   ;;  %v506_v32 = vcombine.low %v21_v31, %v21_v31  ;;  %v507_v33 = vcombine.high %v21_v31, %v21_v31  ;;  %v22_v36 = vld [vmem:[%s818_s0 + $0x8] sm:$0xff] }
   0xb   :  { %555 = vmatpush3.bf16.msra.mxu0 %v622_v9  ;;  %v639_v26 = vld [vmem:[%s817_s1 + $0xf0] sm:$0xff]   ;;  %v643_v30 = vld [vmem:[%s817_s1 + $0xf8] sm:$0xff]   ;;  %v508_v37 = vcombine.low %v22_v36, %v22_v36  ;;  %v509_v38 = vcombine.high %v22_v36, %v22_v36  ;;  %v650_v39 = vld [vmem:[%s817_s1 + $0x100] sm:$0xff]  }
   0xc   :  { %556 = vmatprep.subr.bf16.mxu0 %v625_v12  ;;  %v640_v27 = vld [vmem:[%s817_s1 + $0xb0] sm:$0xff]   ;;  %v647_v34 = vld [vmem:[%s817_s1 + $0xb8] sm:$0xff]   ;;  %374 = vmatprep.mubr.bf16.mxu0 %v507_v33  ;;  %v651_v40 = vld [vmem:[%s817_s1 + $0x108] sm:$0xff]  }
   0xd   :  { %577 = vmatpush3.bf16.msra.mxu1 %v624_v11  ;;  %414 = vmatprep.mubr.bf16.mxu1 %v509_v38  ;;  %v652_v41 = vld [vmem:[%s817_s1 + $0x110] sm:$0xff]   ;;  %v653_v42 = vld [vmem:[%s817_s1 + $0x118] sm:$0xff]   ;;  %v505_v45 = vld [vmem:[%s819_s2] ss:$0 sm:$0xff] }
   0xe   :  { %578 = vmatprep.subr.bf16.mxu1 %v627_v14  ;;  %v646_v43 = vld [vmem:[%s818_s0 + $0x10] ss:$0 sps:$4 sm:$0xff]  }
   0xf   :  { %557 = vmatpush3.bf16.msra.mxu0 %v626_v13 }
  0x10   :  { %558 = vmatprep.subr.bf16.mxu0 %v629_v16 }
  0x11   :  { %579 = vmatpush3.bf16.msra.mxu1 %v628_v15 }
  0x12   :  { %580 = vmatprep.subr.bf16.mxu1 %v631_v18 }
  0x13   :  { %559 = vmatpush3.bf16.msra.mxu0 %v630_v17 }
  0x14   :  { %560 = vmatprep.subr.bf16.mxu0 %v633_v20  ;;  %v548_v20 = vld [vmem:[%s820_s3] ss:$0 sm:$0xff] }
  0x15   :  { %581 = vmatpush3.bf16.msra.mxu1 %v632_v19 }
  0x16   :  { %582 = vmatprep.subr.bf16.mxu1 %v635_v22  ;;  %v549_v22 = vld [vmem:[%s821_s4] ss:$0 sm:$0xff] }
  0x17   :  { %561 = vmatpush3.bf16.msra.mxu0 %v634_v21 }
  0x18   :  { %562 = vmatprep.subr.bf16.mxu0 %v637_v24 }
  0x19   :  { %583 = vmatpush3.bf16.msra.mxu1 %v636_v23 }
  0x1a   :  { %584 = vmatprep.subr.bf16.mxu1 %v639_v26 }
  0x1b   :  { %563 = vmatpush3.bf16.msra.mxu0 %v638_v25 }
  0x1c   :  { %564 = vmatprep.subr.bf16.mxu0 %v641_v28 }
  0x1d   :  { %585 = vmatpush3.bf16.msra.mxu1 %v640_v27 }
  0x1e   :  { %586 = vmatprep.subr.bf16.mxu1 %v643_v30 }
  0x1f   :  { %565 = vmatpush3.bf16.msra.mxu0 %v642_v29 }
  0x20   :  { %599 = vmatprep.subr.bf16.mxu0 %v656_v35 }
  0x21   :  { %587 = vmatpush3.bf16.msra.mxu1 %v647_v34 }
  0x22   :  { %375 = vmatmul.mubr.bf16.vlgmr.msra.gmra.mrb[0].mxu0 %v506_v32 }
  0x23   :  { %600 = vmatpush3.bf16.msra.mxu0 %v650_v39  ;;  %607 = vmatprep.mubr.msk.bf16.mxu0 %vm657_vm0, %v656_v35 }
  0x24   :  { %415 = vmatmul.mubr.bf16.vlgmr.msra.gmra.mrb[0].mxu1 %v508_v37  ;;  %601 = vmatprep.subr.bf16.mxu0 %v656_v35 }
  0x27   :  { %602 = vmatpush3.bf16.msra.mxu0 %v651_v40 }
  0x28   :  { %603 = vmatprep.subr.bf16.mxu0 %v656_v35 }
  0x2b   :  { %604 = vmatpush3.bf16.msra.mxu0 %v652_v41 }
  0x2c   :  { %605 = vmatprep.subr.bf16.mxu0 %v656_v35 }
  0x2f   :  { %606 = vmatpush3.bf16.msra.mxu0 %v653_v42 }
  0x32   :  { %608 = vmatmul.mubr.msk.bf16.vlgmr.msra.gmra.mrb[4].mxu0 %vm338_vm1, %v646_v43 }
  0xf5   :  { %v566_v44 = vpop.f32.mrb[0].mxu0 }
  0xf6   :  { %v567_v46 = vpop.f32.mrb[1].mxu0 }
  0xf7   :  { %v568_v47 = vadd.f32 %v567_v46, %v566_v44  ;;  %v569_v48 = vpop.f32.mrb[2].mxu0  ;;  %v588_v49 = vpop.f32.mrb[0].mxu1 }
  0xf8   :  { %v570_v50 = vpop.f32.mrb[3].mxu0  ;;  %v589_v51 = vpop.f32.mrb[1].mxu1 }
  0xf9   :  { %v377_v52 = vadd.f32 %v568_v47, %v505_v45  ;;  %v590_v53 = vadd.f32 %v589_v51, %v588_v49  ;;  %v591_v54 = vpop.f32.mrb[2].mxu1 }
  0xfa   :  { %v592_v55 = vpop.f32.mrb[3].mxu1 }
  0xfb   :  { %v417_v56 = vadd.f32 %v590_v53, %v377_v52 }
 0x105   :  { %v456_v57 = vpop.f32.mrb[4].mxu0 }
 0x106   :  { %v457_v58 = vadd.f32 %v456_v57, %v417_v56  ;;  %v609_v59 = vpop.f32.mrb[5].mxu0 }
 0x107   :  { %v459_v60 = vpop.f32.mrb[6].mxu0 }
 0x108   :  { %v462_v61 = vmax.f32 %v457_v58, 0.0  ;;  %v610_v62 = vpop.f32.mrb[7].mxu0 }
 0x10a   :  { %v463_v63 = vrot.slane %v462_v61, 4  ;;  %v471_v0 = vmul.f32 %v462_v61, %v462_v61 }
 0x10c   :  { %v464_v1 = vadd.f32 %v463_v63, %v462_v61  ;;  %v472_v2 = vrot.slane %v471_v0, 4 }
 0x10e   :  { %v465_v3 = vrot.slane %v464_v1, 2  ;;  %v473_v4 = vadd.f32 %v472_v2, %v471_v0 }
 0x110   :  { %v466_v5 = vadd.f32 %v465_v3, %v464_v1  ;;  %v474_v6 = vrot.slane %v473_v4, 2 }
 0x112   :  { %v467_v7 = vrot.slane %v466_v5, 1  ;;  %v475_v8 = vadd.f32 %v474_v6, %v473_v4 }
 0x114   :  { %v468_v9 = vadd.f32 %v467_v7, %v466_v5  ;;  %v476_v10 = vrot.slane %v475_v8, 1 }
 0x116   :  { %v470_v11 = vmul.f32 0.125, %v468_v9  ;;  %v477_v12 = vadd.f32 %v476_v10, %v475_v8 }
 0x118   :  { %v478_v13 = vmul.f32 0.125, %v477_v12  ;;  %v479_v14 = vmul.f32 %v470_v11, %v470_v11  ;;  %v484_v18 = vsub.f32 %v462_v61, %v470_v11 }
 0x11a   :  { %v480_v15 = vsub.f32 %v478_v13, %v479_v14 }
 0x11c   :  { %v481_v16 = vmax.f32 %v480_v15, 0.0 }
 0x11e   :  { %v482_v17 = vadd.f32 1e-05, %v481_v16 }
 0x120   :  { %654 = vrsqrt.f32 %v482_v17 }
 0x12a   :  { %v655_v19 = vpop.eup %654 }
 0x12b   :  { %v485_v21 = vmul.f32 %v655_v19, %v484_v18 }
 0x12d   :  { %v492_v23 = vmul.f32 %v548_v20, %v485_v21 }
 0x12f   :  { %v499_v24 = vadd.f32 %v549_v22, %v492_v23 }
 0x131   :  { %500 = vst [vmem:[%s822_s5] sm:$0xff] %v499_v24 }

// kernel: cnn_forward.7
= control target key start
LH: loop header
LB: loop body
LE: loop exit
PB: predicated region body
PF: predicated region fallthrough
CT: control target
= control target key end

     0   :  { %s2076_s0 = inlined_call_operand.vmem [shape: bf16[2,512], index: 0, kind: input, shape index: {}]   ;;  %s2077_s1 = inlined_call_operand.vmem [shape: bf16[512,256], index: 1, kind: input, shape index: {}]   ;;  %s2078_s2 = inlined_call_operand.vmem [shape: f32[1,256], index: 2, kind: input, shape index: {}]   ;;  %s2079_s3 = inlined_call_operand.vmem [shape: f32[1,256], index: 3, kind: input, shape index: {}]   ;;  %s2080_s4 = inlined_call_operand.vmem [shape: f32[1,256], index: 4, kind: input, shape index: {}]   ;;  %s2081_s5 = inlined_call_operand.vmem [shape: bf16[256,128], index: 5, kind: input, shape index: {}]   ;;  %s2082_s6 = inlined_call_operand.vmem [shape: f32[1,128], index: 6, kind: input, shape index: {}]   ;;  %s2083_s7 = inlined_call_operand.vmem [shape: f32[1,128], index: 7, kind: input, shape index: {}]   ;;  %s2084_s8 = inlined_call_operand.vmem [shape: f32[1,128], index: 8, kind: input, shape index: {}]   ;;  %s2085_s9 = inlined_call_operand.vmem [shape: bf16[128,64], index: 9, kind: input, shape index: {}]   ;;  %s2086_s10 = inlined_call_operand.vmem [shape: f32[1,64], index: 10, kind: input, shape index: {}]   ;;  %s2087_s11 = inlined_call_operand.vmem [shape: f32[1,64], index: 11, kind: input, shape index: {}]   ;;  %s2088_s12 = inlined_call_operand.vmem [shape: f32[1,64], index: 12, kind: input, shape index: {}]   ;;  %s2089_s13 = inlined_call_operand.vmem [shape: bf16[64,32], index: 13, kind: input, shape index: {}]   ;;  %s2090_s14 = inlined_call_operand.vmem [shape: f32[1,32], index: 14, kind: input, shape index: {}]   ;;  %s2091_s15 = inlined_call_operand.vmem [shape: f32[1,32], index: 15, kind: input, shape index: {}]   ;;  %s2092_s16 = inlined_call_operand.vmem [shape: f32[1,32], index: 16, kind: input, shape index: {}]   ;;  %s2093_s17 = inlined_call_operand.vmem [shape: bf16[32,10], index: 17, kind: input, shape index: {}]   ;;  %s2094_s18 = inlined_call_operand.vmem [shape: f32[1,10], index: 18, kind: input, shape index: {}]   ;;  %s2095_s19 = inlined_call_operand.hbm [shape: f32[2,10], index: 19, kind: output, shape index: {}]  }
   0x1   :  { %2097 = sst [smem:[#allocation5_spill]] %s2076_s0 }
   0x2   :  { %2098 = sst [smem:[#allocation6_spill]] %s2077_s1 }
   0x3   :  { %2099 = sst [smem:[#allocation7_spill]] %s2078_s2 }
   0x4   :  { %2100 = sst [smem:[#allocation8_spill]] %s2079_s3 }
   0x5   :  { %s2101_s20 = sld [smem:[#allocation6_spill]]  ;;  %v133_v9 = vlaneseq  ;;  %v1590_v10 = vmov 1966171168   ;;  %s2102_s0 = sld [smem:[#allocation5_spill]] }
   0x6   :  { %v153_v11 = vunpack.c.l.s4 %v1590_v10 }
   0x7   :  { %v1727_v14 = vshrl.u32 %v133_v9, 7 }
   0x8   :  { %v154_v15 = vunpack.c.0.s8 %v153_v11 }
   0xa   :  { %v157_v18 = vsub.s32 %v154_v15, %v1727_v14 }
   0xb   :  { %v1430_v0 = vld [vmem:[%s2101_s20 + $0x4] ss:$8 sps:$4 sm:$0xff]   ;;  %v1432_v1 = vld [vmem:[%s2101_s20] ss:$8 sps:$4 sm:$0xff]   ;;  %v1433_v2 = vld [vmem:[%s2101_s20 + $0x14] ss:$8 sps:$4 sm:$0xff]  }
   0xc   :  { %492 = vmatprep.subr.bf16.mxu0 %v1430_v0  ;;  %v1435_v3 = vld [vmem:[%s2101_s20 + $0x10] ss:$8 sps:$4 sm:$0xff]   ;;  %v1436_v4 = vld [vmem:[%s2101_s20 + $0x24] ss:$8 sps:$4 sm:$0xff]   ;;  %v1438_v5 = vld [vmem:[%s2101_s20 + $0x20] ss:$8 sps:$4 sm:$0xff]  }
   0xd   :  { %493 = vmatpush1.bf16.msra.mxu0 %v1432_v1  ;;  %v1439_v6 = vld [vmem:[%s2101_s20 + $0x34] ss:$8 sps:$4 sm:$0xff]   ;;  %v1441_v7 = vld [vmem:[%s2101_s20 + $0x30] ss:$8 sps:$4 sm:$0xff]   ;;  %v1442_v8 = vld [vmem:[%s2101_s20 + $0x44] ss:$8 sps:$4 sm:$0xff]  }
   0xe   :  { %494 = vmatprep.subr.bf16.mxu0 %v1433_v2  ;;  %v1444_v12 = vld [vmem:[%s2101_s20 + $0x40] ss:$8 sps:$4 sm:$0xff]   ;;  %v1445_v13 = vld [vmem:[%s2101_s20 + $0x54] ss:$8 sps:$4 sm:$0xff]   ;;  %v1447_v16 = vld [vmem:[%s2101_s20 + $0x50] ss:$8 sps:$4 sm:$0xff]  }
   0xf   :  { %v1448_v17 = vld [vmem:[%s2101_s20 + $0x64] ss:$8 sps:$4 sm:$0xff]   ;;  %v1234_v19 = vld.sshfl [vmem:[%s2102_s0] sm:$0x33 pattern:$0x75316420] }
  0x10   :  { %v151_v20 = vcombine.high %v1234_v19, %v1234_v19  ;;  %v1450_v21 = vld [vmem:[%s2101_s20 + $0x60] ss:$8 sps:$4 sm:$0xff]   ;;  %v1451_v22 = vld [vmem:[%s2101_s20 + $0x74] ss:$8 sps:$4 sm:$0xff]   ;;  %v1453_v24 = vld [vmem:[%s2101_s20 + $0x70] ss:$8 sps:$4 sm:$0xff]   ;;  %v1802_v43 = vrot.slane %v1234_v19, %v157_v18 }
  0x11   :  { %495 = vmatpush1.bf16.msra.mxu0 %v1435_v3  ;;  %v1454_v25 = vld [vmem:[%s2101_s20 + $0x84] ss:$8 sps:$4 sm:$0xff]   ;;  %v1456_v26 = vld [vmem:[%s2101_s20 + $0x80] ss:$8 sps:$4 sm:$0xff]   ;;  %v1457_v27 = vld [vmem:[%s2101_s20 + $0x94] ss:$8 sps:$4 sm:$0xff]  }
  0x12   :  { %496 = vmatprep.subr.bf16.mxu0 %v1436_v4  ;;  %v165_v23 = vrot.slane %v151_v20, %v157_v18  ;;  %v1459_v28 = vld [vmem:[%s2101_s20 + $0x90] ss:$8 sps:$4 sm:$0xff]   ;;  %v1460_v29 = vld [vmem:[%s2101_s20 + $0xa4] ss:$8 sps:$4 sm:$0xff]   ;;  %v1462_v30 = vld [vmem:[%s2101_s20 + $0xa0] ss:$8 sps:$4 sm:$0xff]  }
  0x13   :  { %v1463_v31 = vld [vmem:[%s2101_s20 + $0xb4] ss:$8 sps:$4 sm:$0xff]   ;;  %v1465_v32 = vld [vmem:[%s2101_s20 + $0xb0] ss:$8 sps:$4 sm:$0xff]   ;;  %v1466_v33 = vld [vmem:[%s2101_s20 + $0xc4] ss:$8 sps:$4 sm:$0xff]  }
  0x14   :  { %524 = vmatprep.mubr.bf16.mxu0 %v165_v23  ;;  %v1468_v34 = vld [vmem:[%s2101_s20 + $0xc0] ss:$8 sps:$4 sm:$0xff]   ;;  %v1469_v35 = vld [vmem:[%s2101_s20 + $0xd4] ss:$8 sps:$4 sm:$0xff]   ;;  %v1471_v36 = vld [vmem:[%s2101_s20 + $0xd0] ss:$8 sps:$4 sm:$0xff]   ;;  %v167_v44 = vcombine.high %v165_v23, %v165_v23 }
  0x15   :  { %497 = vmatpush1.bf16.msra.mxu0 %v1438_v5  ;;  %v1472_v37 = vld [vmem:[%s2101_s20 + $0xe4] ss:$8 sps:$4 sm:$0xff]   ;;  %v1474_v38 = vld [vmem:[%s2101_s20 + $0xe0] ss:$8 sps:$4 sm:$0xff]   ;;  %v1475_v39 = vld [vmem:[%s2101_s20 + $0xf4] ss:$8 sps:$4 sm:$0xff]  }
  0x16   :  { %498 = vmatprep.subr.bf16.mxu0 %v1439_v6  ;;  %v1477_v40 = vld [vmem:[%s2101_s20 + $0xf0] ss:$8 sps:$4 sm:$0xff]   ;;  %v1480_v41 = vld [vmem:[%s2101_s20 + $0x104] ss:$8 sps:$4 sm:$0xff]   ;;  %v1478_v42 = vld [vmem:[%s2101_s20 + $0x100] ss:$8 sps:$4 sm:$0xff]  }
  0x19   :  { %499 = vmatpush1.bf16.msra.mxu0 %v1441_v7 }
  0x1a   :  { %500 = vmatprep.subr.bf16.mxu0 %v1442_v8 }
  0x1d   :  { %501 = vmatpush1.bf16.msra.mxu0 %v1444_v12 }
  0x1e   :  { %502 = vmatprep.subr.bf16.mxu0 %v1445_v13 }
  0x21   :  { %503 = vmatpush1.bf16.msra.mxu0 %v1447_v16 }
  0x22   :  { %504 = vmatprep.subr.bf16.mxu0 %v1448_v17 }
  0x25   :  { %505 = vmatpush1.bf16.msra.mxu0 %v1450_v21 }
  0x26   :  { %506 = vmatprep.subr.bf16.mxu0 %v1451_v22 }
  0x29   :  { %507 = vmatpush1.bf16.msra.mxu0 %v1453_v24 }
  0x2a   :  { %508 = vmatprep.subr.bf16.mxu0 %v1454_v25 }
  0x2d   :  { %509 = vmatpush1.bf16.msra.mxu0 %v1456_v26 }
  0x2e   :  { %510 = vmatprep.subr.bf16.mxu0 %v1457_v27 }
  0x31   :  { %511 = vmatpush1.bf16.msra.mxu0 %v1459_v28 }
  0x32   :  { %512 = vmatprep.subr.bf16.mxu0 %v1460_v29 }
  0x35   :  { %513 = vmatpush1.bf16.msra.mxu0 %v1462_v30 }
  0x36   :  { %514 = vmatprep.subr.bf16.mxu0 %v1463_v31 }
  0x39   :  { %515 = vmatpush1.bf16.msra.mxu0 %v1465_v32 }
  0x3a   :  { %516 = vmatprep.subr.bf16.mxu0 %v1466_v33 }
  0x3d   :  { %517 = vmatpush1.bf16.msra.mxu0 %v1468_v34 }
  0x3e   :  { %518 = vmatprep.subr.bf16.mxu0 %v1469_v35 }
  0x41   :  { %519 = vmatpush1.bf16.msra.mxu0 %v1471_v36 }
  0x42   :  { %520 = vmatprep.subr.bf16.mxu0 %v1472_v37 }
  0x45   :  { %521 = vmatpush1.bf16.msra.mxu0 %v1474_v38 }
  0x46   :  { %522 = vmatprep.subr.bf16.mxu0 %v1475_v39 }
  0x49   :  { %523 = vmatpush1.bf16.msra.mxu0 %v1477_v40 }
  0x4a   :  { %24 = vsyncpa [#allocation3], 0  ;;  %533 = vmatprep.subr.bf16.mxu0 %v1480_v41  ;;  %v1483_v45 = vld [vmem:[%s2101_s20 + $0x114] ss:$8 sps:$4 sm:$0xff]   ;;  %v1481_v46 = vld [vmem:[%s2101_s20 + $0x110] ss:$8 sps:$4 sm:$0xff]   ;;  %v166_v11 = vcombine.high %v1802_v43, %v1802_v43 }
  0x4b   :  { %v1486_v47 = vld [vmem:[%s2101_s20 + $0x124] ss:$8 sps:$4 sm:$0xff]   ;;  %v1484_v48 = vld [vmem:[%s2101_s20 + $0x120] ss:$8 sps:$4 sm:$0xff]   ;;  %v1489_v49 = vld [vmem:[%s2101_s20 + $0x134] ss:$8 sps:$4 sm:$0xff]  }
  0x4c   :  { %525 = vmatmul.mubr.bf16.vlgmr.msra.gmra.mrb[0].mxu0 %v1802_v43  ;;  %v1487_v50 = vld [vmem:[%s2101_s20 + $0x130] ss:$8 sps:$4 sm:$0xff]   ;;  %v1492_v51 = vld [vmem:[%s2101_s20 + $0x144] ss:$8 sps:$4 sm:$0xff]   ;;  %v1490_v52 = vld [vmem:[%s2101_s20 + $0x140] ss:$8 sps:$4 sm:$0xff]  }
  0x4d   :  { %534 = vmatpush1.bf16.msra.mxu0 %v1478_v42  ;;  %565 = vmatprep.mubr.bf16.mxu0 %v167_v44  ;;  %v1495_v53 = vld [vmem:[%s2101_s20 + $0x154] ss:$8 sps:$4 sm:$0xff]   ;;  %v1493_v54 = vld [vmem:[%s2101_s20 + $0x150] ss:$8 sps:$4 sm:$0xff]   ;;  %v1498_v55 = vld [vmem:[%s2101_s20 + $0x164] ss:$8 sps:$4 sm:$0xff]  }
  0x4e   :  { %535 = vmatprep.subr.bf16.mxu0 %v1483_v45  ;;  %v1496_v56 = vld [vmem:[%s2101_s20 + $0x160] ss:$8 sps:$4 sm:$0xff]   ;;  %v1501_v57 = vld [vmem:[%s2101_s20 + $0x174] ss:$8 sps:$4 sm:$0xff]   ;;  %v1499_v58 = vld [vmem:[%s2101_s20 + $0x170] ss:$8 sps:$4 sm:$0xff]  }
  0x4f   :  { %v1504_v59 = vld [vmem:[%s2101_s20 + $0x184] ss:$8 sps:$4 sm:$0xff]   ;;  %v1502_v60 = vld [vmem:[%s2101_s20 + $0x180] ss:$8 sps:$4 sm:$0xff]   ;;  %v1507_v61 = vld [vmem:[%s2101_s20 + $0x194] ss:$8 sps:$4 sm:$0xff]  }
  0x50   :  { %v1505_v62 = vld [vmem:[%s2101_s20 + $0x190] ss:$8 sps:$4 sm:$0xff]   ;;  %v1510_v63 = vld [vmem:[%s2101_s20 + $0x1a4] ss:$8 sps:$4 sm:$0xff]   ;;  %v1508_v0 = vld [vmem:[%s2101_s20 + $0x1a0] ss:$8 sps:$4 sm:$0xff]  }
  0x51   :  { %536 = vmatpush1.bf16.msra.mxu0 %v1481_v46  ;;  %v1513_v1 = vld [vmem:[%s2101_s20 + $0x1b4] ss:$8 sps:$4 sm:$0xff]   ;;  %v1511_v2 = vld [vmem:[%s2101_s20 + $0x1b0] ss:$8 sps:$4 sm:$0xff]   ;;  %v1516_v3 = vld [vmem:[%s2101_s20 + $0x1c4] ss:$8 sps:$4 sm:$0xff]  }
  0x52   :  { %537 = vmatprep.subr.bf16.mxu0 %v1486_v47  ;;  %v1514_v4 = vld [vmem:[%s2101_s20 + $0x1c0] ss:$8 sps:$4 sm:$0xff]   ;;  %v1519_v5 = vld [vmem:[%s2101_s20 + $0x1d4] ss:$8 sps:$4 sm:$0xff]   ;;  %v1517_v6 = vld [vmem:[%s2101_s20 + $0x1d0] ss:$8 sps:$4 sm:$0xff]  }
  0x53   :  { %v1522_v7 = vld [vmem:[%s2101_s20 + $0x1e4] ss:$8 sps:$4 sm:$0xff]   ;;  %v1520_v8 = vld [vmem:[%s2101_s20 + $0x1e0] ss:$8 sps:$4 sm:$0xff]   ;;  %v1525_v9 = vld [vmem:[%s2101_s20 + $0x1f4] ss:$8 sps:$4 sm:$0xff]  }
  0x54   :  { %v1523_v10 = vld [vmem:[%s2101_s20 + $0x1f0] ss:$8 sps:$4 sm:$0xff]   ;;  %v1526_v12 = vld [vmem:[%s2081_s5 + $0x40] sm:$0xff]   ;;  %v1528_v15 = vld [vmem:[%s2081_s5 + $0x48] sm:$0xff]   ;;  %v1946_v29 = vsub.s32 0, %v1727_v14  ;;  %s2103_s3 = sld [smem:[#allocation7_spill]] }
  0x55   :  { %538 = vmatpush1.bf16.msra.mxu0 %v1484_v48  ;;  %v1527_v13 = vld [vmem:[%s2081_s5] sm:$0xff]   ;;  %1341 = vmatprep.subr.bf16.mxu1 %v1526_v12  ;;  %v1529_v16 = vld [vmem:[%s2081_s5 + $0x8] sm:$0xff]   ;;  %v1530_v17 = vld [vmem:[%s2081_s5 + $0x50] sm:$0xff]   ;;  %v1952_v31 = vsub.s32 1, %v1727_v14  ;;  %vm576_vm0 = vcmask 1041408   ;;  %s2104_s20 = sld [smem:[#allocation8_spill]] }
  0x56   :  { %539 = vmatprep.subr.bf16.mxu0 %v1489_v49  ;;  %1342 = vmatpush3.bf16.msra.mxu1 %v1527_v13  ;;  %v1531_v18 = vld [vmem:[%s2081_s5 + $0x10] sm:$0xff]   ;;  %v1532_v19 = vld [vmem:[%s2081_s5 + $0x58] sm:$0xff]   ;;  %v1534_v21 = vld [vmem:[%s2081_s5 + $0x60] sm:$0xff]   ;;  %vm1592_vm1 = vmmov 0   ;;  %vm985_vm2 = vcmask 517120   ;;  %vm1066_vm3 = vcmask 523264  }
  0x57   :  { %1343 = vmatprep.subr.bf16.mxu1 %v1528_v15  ;;  %v1533_v20 = vld [vmem:[%s2081_s5 + $0x18] sm:$0xff]   ;;  %v1535_v22 = vld [vmem:[%s2081_s5 + $0x20] sm:$0xff]   ;;  %v1536_v23 = vld [vmem:[%s2081_s5 + $0x68] sm:$0xff]   ;;  %vm1111_vm4 = vcmask 254976   ;;  %vm1174_vm5 = vcmask 261120   ;;  %s1593_s0 = smov [#allocation2]  }
  0x58   :  { %v1537_v24 = vld [vmem:[%s2081_s5 + $0x28] sm:$0xff]   ;;  %v1538_v25 = vld [vmem:[%s2081_s5 + $0x70] sm:$0xff]   ;;  %v1540_v27 = vld [vmem:[%s2081_s5 + $0x78] sm:$0xff]   ;;  %s1226_s30 = sshll.u32 %s1593_s0, 4  ;;  %vm1218_vm6 = vcmask 74752   ;;  %s1227_s30 = int_to_ptr.vmem [resolvable:$true] %s1226_s30 }
  0x59   :  { %540 = vmatpush1.bf16.msra.mxu0 %v1487_v50  ;;  %v1539_v26 = vld [vmem:[%s2081_s5 + $0x30] sm:$0xff]   ;;  %v1541_v28 = vld [vmem:[%s2081_s5 + $0x38] sm:$0xff]   ;;  %p1571_p1 = scmp.lt.s32.totalorder %s1227_s30, %s1227_s30 }
  0x5a   :  { %541 = vmatprep.subr.bf16.mxu0 %v1492_v51  ;;  %1344 = vmatpush3.bf16.msra.mxu1 %v1529_v16  ;;  %v129_v30 = vld [vmem:[%s2103_s3] sm:$0x3] }
  0x5b   :  { %1345 = vmatprep.subr.bf16.mxu1 %v1530_v17  ;;  %v136_v32 = vrot.slane %v129_v30, %v1946_v29  ;;  %v140_v33 = vrot.slane %v129_v30, %v1952_v31 }
  0x5d   :  { %542 = vmatpush1.bf16.msra.mxu0 %v1490_v52 }
  0x5e   :  { %543 = vmatprep.subr.bf16.mxu0 %v1495_v53  ;;  %1346 = vmatpush3.bf16.msra.mxu1 %v1531_v18 }
  0x5f   :  { %1347 = vmatprep.subr.bf16.mxu1 %v1532_v19 }
  0x61   :  { %544 = vmatpush1.bf16.msra.mxu0 %v1493_v54 }
  0x62   :  { %545 = vmatprep.subr.bf16.mxu0 %v1498_v55  ;;  %1348 = vmatpush3.bf16.msra.mxu1 %v1533_v20  ;;  %v130_v20 = vld [vmem:[%s2104_s20] sm:$0x3] }
  0x63   :  { %1349 = vmatprep.subr.bf16.mxu1 %v1534_v21  ;;  %v131_v21 = vld [vmem:[%s2080_s4] sm:$0x3] }
  0x64   :  { %v643_v30 = vrot.slane %v131_v21, %v1946_v29 }
  0x65   :  { %546 = vmatpush1.bf16.msra.mxu0 %v1496_v56 }
  0x66   :  { %547 = vmatprep.subr.bf16.mxu0 %v1501_v57  ;;  %1350 = vmatpush3.bf16.msra.mxu1 %v1535_v22 }
  0x67   :  { %1351 = vmatprep.subr.bf16.mxu1 %v1536_v23  ;;  %v630_v23 = vrot.slane %v130_v20, %v1946_v29  ;;  %v1543_v29 = vld [vmem:[%s2085_s9 + $0x8] sm:$0xff]  }
  0x69   :  { %548 = vmatpush1.bf16.msra.mxu0 %v1499_v58 }
  0x6a   :  { %549 = vmatprep.subr.bf16.mxu0 %v1504_v59  ;;  %1352 = vmatpush3.bf16.msra.mxu1 %v1537_v24 }
  0x6b   :  { %1353 = vmatprep.subr.bf16.mxu1 %v1538_v25 }
  0x6d   :  { %550 = vmatpush1.bf16.msra.mxu0 %v1502_v60 }
  0x6e   :  { %551 = vmatprep.subr.bf16.mxu0 %v1507_v61  ;;  %1354 = vmatpush3.bf16.msra.mxu1 %v1539_v26  ;;  %v634_v26 = vrot.slane %v130_v20, %v1952_v31  ;;  %v1550_v20 = vld [vmem:[%s2089_s13] sm:$0xff]  }
  0x6f   :  { %1355 = vmatprep.subr.bf16.mxu1 %v1540_v27 }
  0x71   :  { %552 = vmatpush1.bf16.msra.mxu0 %v1505_v62 }
  0x72   :  { %553 = vmatprep.subr.bf16.mxu0 %v1510_v63  ;;  %1356 = vmatpush3.bf16.msra.mxu1 %v1541_v28 }
  0x75   :  { %554 = vmatpush1.bf16.msra.mxu0 %v1508_v0 }
  0x76   :  { %555 = vmatprep.subr.bf16.mxu0 %v1513_v1 }
  0x79   :  { %556 = vmatpush1.bf16.msra.mxu0 %v1511_v2 }
  0x7a   :  { %557 = vmatprep.subr.bf16.mxu0 %v1516_v3 }
  0x7d   :  { %558 = vmatpush1.bf16.msra.mxu0 %v1514_v4 }
  0x7e   :  { %559 = vmatprep.subr.bf16.mxu0 %v1519_v5 }
  0x81   :  { %560 = vmatpush1.bf16.msra.mxu0 %v1517_v6 }
  0x82   :  { %561 = vmatprep.subr.bf16.mxu0 %v1522_v7 }
  0x85   :  { %562 = vmatpush1.bf16.msra.mxu0 %v1520_v8 }
  0x86   :  { %563 = vmatprep.subr.bf16.mxu0 %v1525_v9 }
  0x89   :  { %564 = vmatpush1.bf16.msra.mxu0 %v1523_v10 }
  0x8c   :  { %566 = vmatmul.mubr.bf16.vlgmr.msra.gmra.mrb[0].mxu0 %v166_v11 }
 0x15f   :  { %v567_v34 = vpop.f32.mrb[0].mxu0 }
 0x160   :  { %v1420_v35 = vadd.f32 %v567_v34, %v136_v32  ;;  %v569_v36 = vpop.f32.mrb[1].mxu0 }
 0x161   :  { %v1421_v37 = vadd.f32 %v569_v36, %v140_v33  ;;  %v571_v38 = vpop.f32.mrb[2].mxu0  ;;  %v647_v33 = vrot.slane %v131_v21, %v1952_v31  ;;  %v1544_v31 = vld [vmem:[%s2085_s9 + $0x10] sm:$0xff]   ;;  %v1551_v21 = vld [vmem:[%s2089_s13 + $0x8] sm:$0xff]  }
 0x162   :  { %v574_v39 = vmax.f32 %v1420_v35, 0.0  ;;  %v572_v40 = vpop.f32.mrb[3].mxu0 }
 0x163   :  { %v575_v41 = vmax.f32 %v1421_v37, 0.0 }
 0x164   :  { %v577_v42 = vsel %vm576_vm0, %v574_v39, 0.0  ;;  %v594_v43 = vmul.f32 %v574_v39, %v574_v39 }
 0x165   :  { %v578_v44 = vrot.slane %v577_v42, 4  ;;  %v584_v14 = vsel %vm576_vm0, %v575_v41, 0.0  ;;  %v595_v45 = vmul.f32 %v575_v41, %v575_v41 }
 0x166   :  { %v596_v46 = vsel %vm576_vm0, %v594_v43, 0.0  ;;  %v585_v47 = vrot.slane %v584_v14, 4  ;;  %v1546_v43 = vld [vmem:[%s2085_s9 + $0x20] sm:$0xff]  }
 0x167   :  { %v579_v48 = vadd.f32 %v578_v44, %v577_v42  ;;  %v597_v49 = vrot.slane %v596_v46, 4  ;;  %v603_v50 = vsel %vm576_vm0, %v595_v45, 0.0  ;;  %v1545_v42 = vld [vmem:[%s2085_s9 + $0x18] sm:$0xff]   ;;  %v1547_v44 = vld [vmem:[%s2085_s9 + $0x28] sm:$0xff]  }
 0x168   :  { %v586_v51 = vadd.f32 %v585_v47, %v584_v14  ;;  %v604_v52 = vrot.slane %v603_v50, 4  ;;  %v1548_v14 = vld [vmem:[%s2085_s9 + $0x30] sm:$0xff]   ;;  %v1549_v45 = vld [vmem:[%s2085_s9 + $0x38] sm:$0xff]   ;;  %v1299_v47 = vld [vmem:[%s2082_s6] ss:$0 sm:$0xff] }
 0x169   :  { %v580_v53 = vrot.slane %v579_v48, 2  ;;  %v598_v54 = vadd.f32 %v597_v49, %v596_v46 }
 0x16a   :  { %v587_v55 = vrot.slane %v586_v51, 2  ;;  %v605_v56 = vadd.f32 %v604_v52, %v603_v50 }
 0x16b   :  { %v581_v57 = vadd.f32 %v580_v53, %v579_v48  ;;  %v599_v58 = vrot.slane %v598_v54, 2 }
 0x16c   :  { %v588_v59 = vadd.f32 %v587_v55, %v586_v51  ;;  %v606_v60 = vrot.slane %v605_v56, 2 }
 0x16d   :  { %v582_v61 = vrot.slane %v581_v57, 1  ;;  %v600_v62 = vadd.f32 %v599_v58, %v598_v54 }
 0x16e   :  { %v589_v63 = vrot.slane %v588_v59, 1  ;;  %v607_v0 = vadd.f32 %v606_v60, %v605_v56 }
 0x16f   :  { %v583_v1 = vadd.f32 %v582_v61, %v581_v57  ;;  %v601_v2 = vrot.slane %v600_v62, 1 }
 0x170   :  { %v590_v3 = vadd.f32 %v589_v63, %v588_v59  ;;  %v608_v4 = vrot.slane %v607_v0, 1 }
 0x171   :  { %v592_v5 = vmul.f32 0.5, %v583_v1  ;;  %v602_v6 = vadd.f32 %v601_v2, %v600_v62 }
 0x172   :  { %v593_v7 = vmul.f32 0.5, %v590_v3  ;;  %v609_v8 = vadd.f32 %v608_v4, %v607_v0 }
 0x173   :  { %v610_v9 = vmul.f32 0.5, %v602_v6  ;;  %v612_v10 = vmul.f32 %v592_v5, %v592_v5  ;;  %v622_v22 = vsub.f32 %v574_v39, %v592_v5  ;;  %v1542_v39 = vld [vmem:[%s2085_s9] sm:$0xff]  }
 0x174   :  { %v611_v11 = vmul.f32 0.5, %v609_v8  ;;  %v613_v12 = vmul.f32 %v593_v7, %v593_v7  ;;  %v623_v25 = vsub.f32 %v575_v41, %v593_v7  ;;  %v1591_v41 = vmov 0.0  }
 0x175   :  { %v614_v13 = vsub.f32 %v610_v9, %v612_v10  ;;  %1380 = vmatprep.subr.bf16.mxu1 %v1591_v41 }
 0x176   :  { %v615_v15 = vsub.f32 %v611_v11, %v613_v12 }
 0x177   :  { %v616_v16 = vmax.f32 %v614_v13, 0.0  ;;  %v1316_v13 = vld [vmem:[%s2083_s7] ss:$0 sm:$0xff] }
 0x178   :  { %v617_v17 = vmax.f32 %v615_v15, 0.0 }
 0x179   :  { %v618_v18 = vadd.f32 1e-05, %v616_v16  ;;  %v1317_v16 = vld [vmem:[%s2084_s8] ss:$0 sm:$0xff] }
 0x17a   :  { %v619_v19 = vadd.f32 1e-05, %v617_v17 }
 0x17b   :  { %1556 = vrsqrt.f32 %v618_v18 }
 0x17c   :  { %1558 = vrsqrt.f32 %v619_v19 }
 0x185   :  { %v1557_v24 = vpop.eup %1556 }
 0x186   :  { %v1559_v27 = vpop.eup %1558  ;;  %v624_v28 = vmul.f32 %v1557_v24, %v622_v22  ;;  %v1552_v22 = vld [vmem:[%s2089_s13 + $0x10] sm:$0xff]   ;;  %v1318_v24 = vld [vmem:[%s2086_s10] ss:$0 sm:$0xff] }
 0x187   :  { %v625_v32 = vmul.f32 %v1559_v27, %v623_v25 }
 0x188   :  { %v637_v34 = vmul.f32 %v630_v23, %v624_v28  ;;  %v1553_v23 = vld [vmem:[%s2089_s13 + $0x18] sm:$0xff]  }
 0x189   :  { %v638_v35 = vmul.f32 %v634_v26, %v625_v32 }
 0x18a   :  { %v650_v36 = vadd.f32 %v643_v30, %v637_v34 }
 0x18b   :  { %v651_v37 = vadd.f32 %v647_v33, %v638_v35 }
 0x18c   :  { %v652_v40 = vpack.c.bf16 %v650_v36, %v650_v36 }
 0x18d   :  { %v653_v38 = vpack.c.bf16 %v651_v37, %v651_v37 }
 0x18f   :  { %823 = vmatprep.mubr.bf16.mxu1 %v653_v38 }
 0x190   :  { %824 = vmatmul.mubr.bf16.vlgmr.msra.gmra.mrb[0].mxu1 %v652_v40 }
 0x191   :  { %1381 = vmatpush3.bf16.msra.mxu1 %v1542_v39  ;;  %1396 = vmatprep.mubr.msk.bf16.mxu1 %vm1592_vm1, %v1591_v41 }
 0x192   :  { %1382 = vmatprep.subr.bf16.mxu1 %v1591_v41 }
 0x195   :  { %1383 = vmatpush3.bf16.msra.mxu1 %v1543_v29 }
 0x196   :  { %1384 = vmatprep.subr.bf16.mxu1 %v1591_v41 }
 0x199   :  { %1385 = vmatpush3.bf16.msra.mxu1 %v1544_v31 }
 0x19a   :  { %1386 = vmatprep.subr.bf16.mxu1 %v1591_v41 }
 0x19d   :  { %1387 = vmatpush3.bf16.msra.mxu1 %v1545_v42 }
 0x19e   :  { %1388 = vmatprep.subr.bf16.mxu1 %v1591_v41 }
 0x1a1   :  { %1389 = vmatpush3.bf16.msra.mxu1 %v1546_v43 }
 0x1a2   :  { %1390 = vmatprep.subr.bf16.mxu1 %v1591_v41 }
 0x1a5   :  { %1391 = vmatpush3.bf16.msra.mxu1 %v1547_v44 }
 0x1a6   :  { %1392 = vmatprep.subr.bf16.mxu1 %v1591_v41 }
 0x1a9   :  { %1393 = vmatpush3.bf16.msra.mxu1 %v1548_v14 }
 0x1aa   :  { %1394 = vmatprep.subr.bf16.mxu1 %v1591_v41 }
 0x1ad   :  { %1395 = vmatpush3.bf16.msra.mxu1 %v1549_v45 }
 0x1ae   :  { %1400 = vmatprep.subr.bf16.mxu1 %v1591_v41 }
 0x263   :  { %v1357_v46 = vpop.f32.mrb[0].mxu1 }
 0x264   :  { %v1358_v48 = vpop.f32.mrb[1].mxu1 }
 0x265   :  { %v1359_v49 = vadd.f32 %v1358_v48, %v1357_v46  ;;  %v1360_v50 = vpop.f32.mrb[2].mxu1 }
 0x266   :  { %v1361_v51 = vpop.f32.mrb[3].mxu1 }
 0x267   :  { %v826_v52 = vadd.f32 %v1359_v49, %v1299_v47 }
 0x269   :  { %v831_v53 = vmax.f32 %v826_v52, 0.0 }
 0x26b   :  { %v832_v54 = vsel %vm576_vm0, %v831_v53, 0.0  ;;  %v840_v55 = vmul.f32 %v831_v53, %v831_v53 }
 0x26c   :  { %v833_v56 = vrot.slane %v832_v54, 4 }
 0x26d   :  { %v841_v57 = vsel %vm576_vm0, %v840_v55, 0.0 }
 0x26e   :  { %v834_v58 = vadd.f32 %v833_v56, %v832_v54  ;;  %v842_v59 = vrot.slane %v841_v57, 4  ;;  %v1327_v54 = vld [vmem:[%s2087_s11] ss:$0 sm:$0xff] }
 0x26f   :  { %v1328_v56 = vld [vmem:[%s2088_s12] ss:$0 sm:$0xff] }
 0x270   :  { %v835_v60 = vrot.slane %v834_v58, 2  ;;  %v843_v61 = vadd.f32 %v842_v59, %v841_v57 }
 0x272   :  { %v836_v62 = vadd.f32 %v835_v60, %v834_v58  ;;  %v844_v63 = vrot.slane %v843_v61, 2  ;;  %v1554_v60 = vld [vmem:[%s2093_s17] sm:$0xff]  }
 0x274   :  { %v837_v0 = vrot.slane %v836_v62, 1  ;;  %v845_v1 = vadd.f32 %v844_v63, %v843_v61  ;;  %v1555_v61 = vld [vmem:[%s2093_s17 + $0x8] sm:$0xff]  }
 0x276   :  { %v838_v2 = vadd.f32 %v837_v0, %v836_v62  ;;  %v846_v3 = vrot.slane %v845_v1, 1  ;;  %v1329_v62 = vld [vmem:[%s2090_s14] ss:$0 sm:$0xff] }
 0x278   :  { %v839_v4 = vmul.f32 0.5, %v838_v2  ;;  %v847_v5 = vadd.f32 %v846_v3, %v845_v1 }
 0x27a   :  { %v848_v6 = vmul.f32 0.5, %v847_v5  ;;  %v849_v7 = vmul.f32 %v839_v4, %v839_v4  ;;  %v854_v11 = vsub.f32 %v831_v53, %v839_v4 }
 0x27c   :  { %v850_v8 = vsub.f32 %v848_v6, %v849_v7 }
 0x27e   :  { %v851_v9 = vmax.f32 %v850_v8, 0.0 }
 0x280   :  { %v852_v10 = vadd.f32 1e-05, %v851_v9 }
 0x282   :  { %1560 = vrsqrt.f32 %v852_v10 }
 0x28c   :  { %v1561_v12 = vpop.eup %1560 }
 0x28d   :  { %v855_v15 = vmul.f32 %v1561_v12, %v854_v11 }
 0x28f   :  { %v862_v17 = vmul.f32 %v1316_v13, %v855_v15 }
 0x291   :  { %v869_v18 = vadd.f32 %v1317_v16, %v862_v17 }
 0x293   :  { %v870_v19 = vpack.c.bf16 %v869_v18, %v869_v18 }
 0x295   :  { %1397 = vmatmul.mubr.bf16.vlgmr.msra.gmra.mrb[4].mxu1 %v870_v19 }
 0x296   :  { %1408 = vmatprep.mubr.msk.bf16.mxu1 %vm1592_vm1, %v1591_v41  ;;  %1401 = vmatpush3.bf16.msra.mxu1 %v1550_v20 }
 0x297   :  { %1402 = vmatprep.subr.bf16.mxu1 %v1591_v41 }
 0x29a   :  { %1403 = vmatpush3.bf16.msra.mxu1 %v1551_v21 }
 0x29b   :  { %1404 = vmatprep.subr.bf16.mxu1 %v1591_v41 }
 0x29e   :  { %1405 = vmatpush3.bf16.msra.mxu1 %v1552_v22 }
 0x29f   :  { %1406 = vmatprep.subr.bf16.mxu1 %v1591_v41 }
 0x2a2   :  { %1407 = vmatpush3.bf16.msra.mxu1 %v1553_v23 }
 0x2a3   :  { %1412 = vmatprep.subr.bf16.mxu1 %v1591_v41 }
 0x368   :  { %v978_v25 = vpop.f32.mrb[4].mxu1 }
 0x369   :  { %v979_v26 = vadd.f32 %v1318_v24, %v978_v25  ;;  %v1398_v27 = vpop.f32.mrb[5].mxu1 }
 0x36a   :  { %v981_v28 = vpop.f32.mrb[6].mxu1 }
 0x36b   :  { %v984_v30 = vmax.f32 %v979_v26, 0.0  ;;  %v1399_v32 = vpop.f32.mrb[7].mxu1  ;;  %v1335_v28 = vld [vmem:[%s2091_s15] ss:$0 sm:$0xff]  ;;  %s1566_s15 = scalar_lea.vmem %s1227_s30, 32 }
 0x36c   :  { %v1336_v32 = vld [vmem:[%s2092_s16] ss:$0 sm:$0xff]  ;;  %p1567_p0 = scmp.ne.s32.totalorder %s1227_s30, %s1566_s15  ;;  %p1572_p2 = scmp.lt.s32.totalorder %s1566_s15, %s1566_s15 }
 0x36d   :  { %v986_v33 = vsel %vm985_vm2, %v984_v30, 0.0  ;;  %v994_v34 = vmul.f32 %v984_v30, %v984_v30 }
 0x36e   :  { %v987_v35 = vrot.slane %v986_v33, 4  ;;  %p1573_p3 = por %p1572_p2, %p1571_p1 }
 0x36f   :  { %v995_v36 = vsel %vm985_vm2, %v994_v34, 0.0 }
 0x370   :  { %v988_v37 = vadd.f32 %v987_v35, %v986_v33  ;;  %v996_v38 = vrot.slane %v995_v36, 4  ;;  %p1574_p4 = pnand %p1573_p3, %p1567_p0 }
 0x372   :  { %v989_v40 = vrot.slane %v988_v37, 2  ;;  %v997_v39 = vadd.f32 %v996_v38, %v995_v36  ;;  %v1337_v36 = vld [vmem:[%s2094_s18] ss:$0 sm:$0xff] }
 0x374   :  { %v990_v29 = vadd.f32 %v989_v40, %v988_v37  ;;  %v998_v31 = vrot.slane %v997_v39, 2 }
 0x376   :  { %v991_v42 = vrot.slane %v990_v29, 1  ;;  %v999_v43 = vadd.f32 %v998_v31, %v997_v39 }
 0x378   :  { %v992_v44 = vadd.f32 %v991_v42, %v990_v29  ;;  %v1000_v14 = vrot.slane %v999_v43, 1 }
 0x37a   :  { %v993_v45 = vmul.f32 0.5, %v992_v44  ;;  %v1001_v46 = vadd.f32 %v1000_v14, %v999_v43 }
 0x37c   :  { %v1002_v47 = vmul.f32 0.5, %v1001_v46  ;;  %v1003_v48 = vmul.f32 %v993_v45, %v993_v45  ;;  %v1008_v52 = vsub.f32 %v984_v30, %v993_v45 }
 0x37e   :  { %v1004_v49 = vsub.f32 %v1002_v47, %v1003_v48 }
 0x380   :  { %v1005_v50 = vmax.f32 %v1004_v49, 0.0 }
 0x382   :  { %v1006_v51 = vadd.f32 1e-05, %v1005_v50 }
 0x384   :  { %1562 = vrsqrt.f32 %v1006_v51 }
 0x38e   :  { %v1563_v53 = vpop.eup %1562 }
 0x38f   :  { %v1009_v55 = vmul.f32 %v1563_v53, %v1008_v52 }
 0x391   :  { %v1016_v57 = vmul.f32 %v1327_v54, %v1009_v55 }
 0x393   :  { %v1023_v58 = vadd.f32 %v1328_v56, %v1016_v57 }
 0x395   :  { %v1024_v59 = vpack.c.bf16 %v1023_v58, %v1023_v58 }
 0x397   :  { %1409 = vmatmul.mubr.msk.bf16.vlgmr.msra.gmra.mrb[8].mxu1 %vm1066_vm3, %v1024_v59 }
 0x398   :  { %1416 = vmatprep.mubr.msk.bf16.mxu1 %vm1592_vm1, %v1591_v41  ;;  %1413 = vmatpush3.bf16.msra.mxu1 %v1554_v60 }
 0x399   :  { %1414 = vmatprep.subr.bf16.mxu1 %v1591_v41 }
 0x39c   :  { %1415 = vmatpush3.bf16.msra.mxu1 %v1555_v61 }
 0x46a   :  { %v1104_v63 = vpop.f32.mrb[8].mxu1 }
 0x46b   :  { %v1105_v0 = vadd.f32 %v1329_v62, %v1104_v63  ;;  %v1410_v1 = vpop.f32.mrb[9].mxu1 }
 0x46c   :  { %v1107_v2 = vpop.f32.mrb[10].mxu1 }
 0x46d   :  { %v1110_v3 = vmax.f32 %v1105_v0, 0.0  ;;  %v1411_v4 = vpop.f32.mrb[11].mxu1 }
 0x46f   :  { %v1112_v5 = vsel %vm1111_vm4, %v1110_v3, 0.0  ;;  %v1120_v6 = vmul.f32 %v1110_v3, %v1110_v3 }
 0x470   :  { %v1113_v7 = vrot.slane %v1112_v5, 4 }
 0x471   :  { %v1121_v41 = vsel %vm1111_vm4, %v1120_v6, 0.0 }
 0x472   :  { %v1114_v8 = vadd.f32 %v1113_v7, %v1112_v5  ;;  %v1122_v9 = vrot.slane %v1121_v41, 4 }
 0x474   :  { %v1115_v10 = vrot.slane %v1114_v8, 2  ;;  %v1123_v11 = vadd.f32 %v1122_v9, %v1121_v41 }
 0x476   :  { %v1116_v12 = vadd.f32 %v1115_v10, %v1114_v8  ;;  %v1124_v13 = vrot.slane %v1123_v11, 2 }
 0x478   :  { %v1117_v15 = vrot.slane %v1116_v12, 1  ;;  %v1125_v16 = vadd.f32 %v1124_v13, %v1123_v11 }
 0x47a   :  { %v1118_v17 = vadd.f32 %v1117_v15, %v1116_v12  ;;  %v1126_v18 = vrot.slane %v1125_v16, 1 }
 0x47c   :  { %v1119_v19 = vmul.f32 0.5, %v1118_v17  ;;  %v1127_v20 = vadd.f32 %v1126_v18, %v1125_v16 }
 0x47e   :  { %v1128_v21 = vmul.f32 0.5, %v1127_v20  ;;  %v1129_v22 = vmul.f32 %v1119_v19, %v1119_v19  ;;  %v1134_v26 = vsub.f32 %v1110_v3, %v1119_v19 }
 0x480   :  { %v1130_v23 = vsub.f32 %v1128_v21, %v1129_v22 }
 0x482   :  { %v1131_v24 = vmax.f32 %v1130_v23, 0.0 }
 0x484   :  { %v1132_v25 = vadd.f32 1e-05, %v1131_v24 }
 0x486   :  { %1564 = vrsqrt.f32 %v1132_v25 }
 0x490   :  { %v1565_v27 = vpop.eup %1564 }
 0x491   :  { %v1135_v30 = vmul.f32 %v1565_v27, %v1134_v26 }
 0x493   :  { %v1142_v33 = vmul.f32 %v1335_v28, %v1135_v30 }
 0x495   :  { %v1149_v34 = vadd.f32 %v1336_v32, %v1142_v33 }
 0x497   :  { %v1150_v35 = vpack.c.bf16 %v1149_v34, %v1149_v34 }
 0x499   :  { %1417 = vmatmul.mubr.msk.bf16.vlgmr.msra.gmra.mrb[12].mxu1 %vm1174_vm5, %v1150_v35 }
 0x56c   :  { %v1212_v37 = vpop.f32.mrb[12].mxu1 }
 0x56d   :  { %v1213_v38 = vadd.f32 %v1337_v36, %v1212_v37  ;;  %v1418_v40 = vpop.f32.mrb[13].mxu1 }
 0x56e   :  { %v1215_v39 = vpop.f32.mrb[14].mxu1 }
 0x56f   :  { %v1419_v29 = vpop.f32.mrb[15].mxu1  ;;  %1219 = vst.msk [vmem:[#allocation2] sm:$0x3] %vm1218_vm6, %v1213_v38 }
 0x570   :  { %1577 = shalt.err (!%p1574_p4)
}
 0x571   :  { %s1578_s18 = scalar_lea.hbm %s2095_s19, 32 }
 0x572   :  { %p1579_p5 = scmp.ne.s32.totalorder %s2095_s19, %s1578_s18  ;;  %p1582_p6 = scmp.lt.u32.totalorder %s1578_s18, %s2095_s19 }
 0x574   :  { %p1584_p7 = pnand %p1582_p6, %p1579_p5 }
 0x576   :  { %1587 = shalt.err (!%p1584_p7)
}
 0x577   :  { %1229 = dma.vmem_to_hbm [thread:$0]  %s1227_s30, 32, %s2095_s19, [#allocation3]  }
 0x578   :  { %1588 = dma.done.wait [#allocation3], 32  }
 0x579   :  { %1589 = vsyncadd [#allocation3], 4294967264 }
 0x57a   :  { %1233 = vsyncpa [#allocation3], 1 }

</bundles_post_ra>
